<compile_context>
chip_gen: v7x
topology: tpu7x:2x2x1
jax: 0.10.0
libtpu: 0.0.40
codegen_flags: <defaults>
</compile_context>

<pallas_src>
import jax
import jax.numpy as jnp
from jax.experimental import pallas as pl
from jax.experimental.pallas import tpu as pltpu

HIDDEN = 256
W_OUT = 4            # chParam.w (synthetic choice, see header note)
OUT_PAD = 128        # lane-dense padded width for the final MXU pass
MAX_TILE_M = 2048    # big tile -> amortize per-grid-step overhead
MIN_TILE_M = 256     # multiple of 256 -> fills v6e/v7x MXU M dim


def _round_up(x, m):
    return ((x + m - 1) // m) * m


def _choose_tile_m(n):
    """Adaptive batch tile: aim for >=2 grid steps (v7x megacore), cap at
    MAX_TILE_M, floor at MIN_TILE_M, never pad a small batch up to a huge tile."""
    half = -(-n // 2)                       # cdiv(n, 2)
    target = _round_up(max(half, 1), MIN_TILE_M)
    return int(min(MAX_TILE_M, max(MIN_TILE_M, target)))


def decoder_kernel(x_ref, w1_ref, bpack_ref, whid_ref, w5_ref, b5_ref, o_ref):
    # x_ref: (TILE_M, 2) f32 — one batch tile, full feature dim.
    x = x_ref[...]

    # Layer 1: K=2 -> keep it on the VPU as two broadcast FMAs (no MXU pass).
    #   h = x[:,0:1] * w1[0,:] + x[:,1:2] * w1[1,:] + b1
    h = (x[:, 0:1] * w1_ref[0:1, :]
         + x[:, 1:2] * w1_ref[1:2, :]
         + bpack_ref[0:1, :])
    h = jnp.maximum(h, 0.0)

    # Layers 2-4: (TILE_M, 256) @ (256, 256), bf16 operands, f32 accumulation.
    # Bias-add / ReLU stay in f32 on the VPU (v5e has no bf16 VPU path).
    for layer in range(3):
        h = jnp.dot(h.astype(jnp.bfloat16), whid_ref[layer],
                    preferred_element_type=jnp.float32)
        h = h + bpack_ref[layer + 1:layer + 2, :]
        h = jnp.maximum(h, 0.0)

    # Output layer: (TILE_M, 256) @ (256, 128 padded) on the MXU.
    logits = jnp.dot(h.astype(jnp.bfloat16), w5_ref[...],
                     preferred_element_type=jnp.float32) + b5_ref[...]

    # Lane-dense transposed store: transpose the tile-aligned (TILE_M, 128)
    # logits on the XLU (which has slack while the MXU is busy), keep only the
    # W_OUT useful rows, and run the sigmoid on that small (W_OUT, TILE_M)
    # slab (32x less EUP/VPU work and 32x less HBM write than the padded store).
    logits_t = jnp.transpose(logits)                # (OUT_PAD, TILE_M)
    out_t = logits_t[:W_OUT, :]                     # (W_OUT, TILE_M)
    # sigmoid(x) == 0.5 * (tanh(x/2) + 1)  (exact; keeps the divide off the VALU)
    o_ref[...] = (0.5 * (jnp.tanh(0.5 * out_t) + 1.0)).astype(o_ref.dtype)


def decoder_forward(x, params):
    """x: (N, 2) float32.  params: dict of f32 weights/biases.  Returns (N, W_OUT)."""
    N, F = x.shape
    assert F == 2

    tile_m = _choose_tile_m(N)
    n_pad = pl.cdiv(N, tile_m) * tile_m
    if n_pad != N:
        x = jnp.pad(x, ((0, n_pad - N), (0, 0)))

    # Layer-1 weights stay f32 (VPU path); hidden/output weights go to bf16.
    w1 = params["w1"]
    whid = jnp.stack([params["w2"], params["w3"], params["w4"]],
                     axis=0).astype(jnp.bfloat16)          # (3, 256, 256)
    bpack = jnp.concatenate([params["b1"], params["b2"],
                             params["b3"], params["b4"]], axis=0)  # (4, 256) f32

    # Zero-pad the output layer to OUT_PAD lanes (full-width MXU pass).
    w5 = jnp.zeros((HIDDEN, OUT_PAD), jnp.float32).at[:, :W_OUT].set(params["w5"])
    w5 = w5.astype(jnp.bfloat16)
    b5 = jnp.zeros((1, OUT_PAD), jnp.float32).at[:, :W_OUT].set(params["b5"])

    grid = (n_pad // tile_m,)

    # Full (untiled) blocks for all weights/biases; only the batch axis is tiled.
    def full_spec(shape):
        return pl.BlockSpec(shape, lambda i: (0,) * len(shape))

    flops = 2 * n_pad * (2 * HIDDEN + 3 * HIDDEN * HIDDEN + HIDDEN * OUT_PAD)
    bytes_accessed = (n_pad * 2 * 4                      # x in
                      + w1.size * 4 + bpack.size * 4     # f32 params
                      + whid.size * 2 + w5.size * 2      # bf16 params
                      + b5.size * 4
                      + W_OUT * n_pad * 4)               # transposed output
    cost = pl.CostEstimate(flops=flops,
                           transcendentals=n_pad * W_OUT,
                           bytes_accessed=bytes_accessed)

    out_t = pl.pallas_call(
        decoder_kernel,
        out_shape=jax.ShapeDtypeStruct((W_OUT, n_pad), jnp.float32),
        grid_spec=pltpu.PrefetchScalarGridSpec(
            num_scalar_prefetch=0,
            grid=grid,
            in_specs=[
                pl.BlockSpec((tile_m, 2), lambda i: (i, 0)),   # x tile
                full_spec(w1.shape),
                full_spec(bpack.shape),
                full_spec(whid.shape),
                full_spec(w5.shape),
                full_spec(b5.shape),
            ],
            out_specs=pl.BlockSpec((W_OUT, tile_m), lambda i: (0, i)),
        ),
        compiler_params=pltpu.CompilerParams(
            dimension_semantics=("parallel",),
            vmem_limit_bytes=32 << 20),
        cost_estimate=cost,
    )(x, w1, bpack, whid, w5, b5)

    # Tiny (W_OUT, N) -> (N, W_OUT) transpose to match the torch output layout.
    return jnp.transpose(out_t[:, :N])


def init_params(key):
    """Deterministic synthetic init (shapes follow the torch module __init__)."""
    keys = jax.random.split(key, 10)

    def linear(kw, kb, fan_in, fan_out):
        bound = 1.0 / jnp.sqrt(jnp.float32(fan_in))
        w = jax.random.uniform(kw, (fan_in, fan_out), jnp.float32, -bound, bound)
        b = jax.random.uniform(kb, (1, fan_out), jnp.float32, -bound, bound)
        return w, b

    w1, b1 = linear(keys[0], keys[1], 2, HIDDEN)
    w2, b2 = linear(keys[2], keys[3], HIDDEN, HIDDEN)
    w3, b3 = linear(keys[4], keys[5], HIDDEN, HIDDEN)
    w4, b4 = linear(keys[6], keys[7], HIDDEN, HIDDEN)
    w5, b5 = linear(keys[8], keys[9], HIDDEN, W_OUT)
    return dict(w1=w1, b1=b1, w2=w2, b2=b2, w3=w3, b3=b3,
                w4=w4, b4=b4, w5=w5, b5=b5)


def decoder_ref(x, p):
    """Pure-JAX f32 reference of the torch forward pass."""
    h = jax.nn.relu(x @ p["w1"] + p["b1"])
    h = jax.nn.relu(h @ p["w2"] + p["b2"])
    h = jax.nn.relu(h @ p["w3"] + p["b3"])
    h = jax.nn.relu(h @ p["w4"] + p["b4"])
    return jax.nn.sigmoid(h @ p["w5"] + p["b5"])


if __name__ == "__main__":
    key = jax.random.PRNGKey(0)
    k_params, k_x = jax.random.split(key)

    params = init_params(k_params)

    # rx_sig: (N, 2) received I/Q samples (small test batch; tile adapts to N).
    N = 256
    rx_sig = jax.random.normal(k_x, (N, 2), jnp.float32)

    out = decoder_forward(rx_sig, params)
    out = jax.block_until_ready(out)

    ref = decoder_ref(rx_sig, params)
    assert out.shape == (N, W_OUT)
    # bf16 matmul operands (f32 accumulation) -> looser tolerance vs f32 reference.
    max_err = float(jnp.max(jnp.abs(out - ref)))
    assert max_err < 3e-2, f"max abs err {max_err} too large"

    print("KERNEL_OK")
</pallas_src>

<mosaic_0001>
module attributes {stable_mosaic.version = 11 : i64} {
  func.func @decoder_kernel(%arg0: i32, %arg1: memref<256x2xf32, #tpu.memory_space<vmem>>, %arg2: memref<2x256xf32, #tpu.memory_space<vmem>>, %arg3: memref<4x256xf32, #tpu.memory_space<vmem>>, %arg4: memref<3x256x256xbf16, #tpu.memory_space<vmem>>, %arg5: memref<256x128xbf16, #tpu.memory_space<vmem>>, %arg6: memref<1x128xf32, #tpu.memory_space<vmem>>, %arg7: memref<4x256xf32, #tpu.memory_space<vmem>>) attributes {dimension_semantics = [#tpu.dimension_semantics<parallel>], iteration_bounds = array<i64: 1>, scalar_prefetch = 0 : i64, scratch_operands = 0 : i64, tpu.core_type = #tpu.core_type<tc>, window_params = [{transform_indices = @transform_0, window_bounds = array<i64: 256, 2>}, {pipeline_mode = #tpu.pipeline_mode<synchronous>, transform_indices = @transform_1, window_bounds = array<i64: 2, 256>}, {pipeline_mode = #tpu.pipeline_mode<synchronous>, transform_indices = @transform_2, window_bounds = array<i64: 4, 256>}, {pipeline_mode = #tpu.pipeline_mode<synchronous>, transform_indices = @transform_3, window_bounds = array<i64: 3, 256, 256>}, {pipeline_mode = #tpu.pipeline_mode<synchronous>, transform_indices = @transform_4, window_bounds = array<i64: 256, 128>}, {pipeline_mode = #tpu.pipeline_mode<synchronous>, transform_indices = @transform_5, window_bounds = array<i64: 1, 128>}, {transform_indices = @transform_6, window_bounds = array<i64: 4, 256>}]} {
    %c0 = arith.constant 0 : index
    %c0_0 = arith.constant 0 : index
    %0 = vector.load %arg1[%c0, %c0_0] : memref<256x2xf32, #tpu.memory_space<vmem>>, vector<256x2xf32>
    %1 = vector.extract_strided_slice %0 {offsets = [0, 0], sizes = [256, 1], strides = [1, 1]} : vector<256x2xf32> to vector<256x1xf32>
    %c0_1 = arith.constant 0 : index
    %c0_2 = arith.constant 0 : index
    %2 = vector.load %arg2[%c0_1, %c0_2] : memref<2x256xf32, #tpu.memory_space<vmem>>, vector<1x256xf32>
    %3 = vector.broadcast %1 : vector<256x1xf32> to vector<256x256xf32>
    %4 = vector.broadcast %2 : vector<1x256xf32> to vector<256x256xf32>
    %5 = arith.mulf %3, %4 : vector<256x256xf32>
    %6 = vector.extract_strided_slice %0 {offsets = [0, 1], sizes = [256, 1], strides = [1, 1]} : vector<256x2xf32> to vector<256x1xf32>
    %c1 = arith.constant 1 : index
    %c0_3 = arith.constant 0 : index
    %7 = vector.load %arg2[%c1, %c0_3] : memref<2x256xf32, #tpu.memory_space<vmem>>, vector<1x256xf32>
    %8 = vector.broadcast %6 : vector<256x1xf32> to vector<256x256xf32>
    %9 = vector.broadcast %7 : vector<1x256xf32> to vector<256x256xf32>
    %10 = arith.mulf %8, %9 : vector<256x256xf32>
    %11 = arith.addf %5, %10 : vector<256x256xf32>
    %c0_4 = arith.constant 0 : index
    %c0_5 = arith.constant 0 : index
    %12 = vector.load %arg3[%c0_4, %c0_5] : memref<4x256xf32, #tpu.memory_space<vmem>>, vector<1x256xf32>
    %13 = vector.broadcast %12 : vector<1x256xf32> to vector<256x256xf32>
    %14 = arith.addf %11, %13 : vector<256x256xf32>
    %cst = arith.constant 0.000000e+00 : f32
    %15 = vector.broadcast %cst : f32 to vector<256x256xf32>
    %16 = arith.maximumf %14, %15 : vector<256x256xf32>
    %17 = arith.truncf %16 : vector<256x256xf32> to vector<256x256xbf16>
    %c0_6 = arith.constant 0 : index
    %c0_7 = arith.constant 0 : index
    %c0_8 = arith.constant 0 : index
    %18 = vector.load %arg4[%c0_6, %c0_7, %c0_8] : memref<3x256x256xbf16, #tpu.memory_space<vmem>>, vector<1x256x256xbf16>
    %19 = vector.shape_cast %18 : vector<1x256x256xbf16> to vector<256x256xbf16>
    %cst_9 = arith.constant dense<0.000000e+00> : vector<256x256xf32>
    %20 = tpu.matmul %17, %19, %cst_9 {dimension_numbers = #tpu.dot_dimension_numbers<[1], [0], [0], [1], [0, 0, 1, 1], [], []>} : vector<256x256xbf16>, vector<256x256xbf16>, vector<256x256xf32> -> vector<256x256xf32>
    %c1_10 = arith.constant 1 : index
    %c0_11 = arith.constant 0 : index
    %21 = vector.load %arg3[%c1_10, %c0_11] : memref<4x256xf32, #tpu.memory_space<vmem>>, vector<1x256xf32>
    %22 = vector.broadcast %21 : vector<1x256xf32> to vector<256x256xf32>
    %23 = arith.addf %20, %22 : vector<256x256xf32>
    %cst_12 = arith.constant 0.000000e+00 : f32
    %24 = vector.broadcast %cst_12 : f32 to vector<256x256xf32>
    %25 = arith.maximumf %23, %24 : vector<256x256xf32>
    %26 = arith.truncf %25 : vector<256x256xf32> to vector<256x256xbf16>
    %c1_13 = arith.constant 1 : index
    %c0_14 = arith.constant 0 : index
    %c0_15 = arith.constant 0 : index
    %27 = vector.load %arg4[%c1_13, %c0_14, %c0_15] : memref<3x256x256xbf16, #tpu.memory_space<vmem>>, vector<1x256x256xbf16>
    %28 = vector.shape_cast %27 : vector<1x256x256xbf16> to vector<256x256xbf16>
    %cst_16 = arith.constant dense<0.000000e+00> : vector<256x256xf32>
    %29 = tpu.matmul %26, %28, %cst_16 {dimension_numbers = #tpu.dot_dimension_numbers<[1], [0], [0], [1], [0, 0, 1, 1], [], []>} : vector<256x256xbf16>, vector<256x256xbf16>, vector<256x256xf32> -> vector<256x256xf32>
    %c2 = arith.constant 2 : index
    %c0_17 = arith.constant 0 : index
    %30 = vector.load %arg3[%c2, %c0_17] : memref<4x256xf32, #tpu.memory_space<vmem>>, vector<1x256xf32>
    %31 = vector.broadcast %30 : vector<1x256xf32> to vector<256x256xf32>
    %32 = arith.addf %29, %31 : vector<256x256xf32>
    %cst_18 = arith.constant 0.000000e+00 : f32
    %33 = vector.broadcast %cst_18 : f32 to vector<256x256xf32>
    %34 = arith.maximumf %32, %33 : vector<256x256xf32>
    %35 = arith.truncf %34 : vector<256x256xf32> to vector<256x256xbf16>
    %c2_19 = arith.constant 2 : index
    %c0_20 = arith.constant 0 : index
    %c0_21 = arith.constant 0 : index
    %36 = vector.load %arg4[%c2_19, %c0_20, %c0_21] : memref<3x256x256xbf16, #tpu.memory_space<vmem>>, vector<1x256x256xbf16>
    %37 = vector.shape_cast %36 : vector<1x256x256xbf16> to vector<256x256xbf16>
    %cst_22 = arith.constant dense<0.000000e+00> : vector<256x256xf32>
    %38 = tpu.matmul %35, %37, %cst_22 {dimension_numbers = #tpu.dot_dimension_numbers<[1], [0], [0], [1], [0, 0, 1, 1], [], []>} : vector<256x256xbf16>, vector<256x256xbf16>, vector<256x256xf32> -> vector<256x256xf32>
    %c3 = arith.constant 3 : index
    %c0_23 = arith.constant 0 : index
    %39 = vector.load %arg3[%c3, %c0_23] : memref<4x256xf32, #tpu.memory_space<vmem>>, vector<1x256xf32>
    %40 = vector.broadcast %39 : vector<1x256xf32> to vector<256x256xf32>
    %41 = arith.addf %38, %40 : vector<256x256xf32>
    %cst_24 = arith.constant 0.000000e+00 : f32
    %42 = vector.broadcast %cst_24 : f32 to vector<256x256xf32>
    %43 = arith.maximumf %41, %42 : vector<256x256xf32>
    %44 = arith.truncf %43 : vector<256x256xf32> to vector<256x256xbf16>
    %c0_25 = arith.constant 0 : index
    %c0_26 = arith.constant 0 : index
    %45 = vector.load %arg5[%c0_25, %c0_26] : memref<256x128xbf16, #tpu.memory_space<vmem>>, vector<256x128xbf16>
    %cst_27 = arith.constant dense<0.000000e+00> : vector<256x128xf32>
    %46 = tpu.matmul %44, %45, %cst_27 {dimension_numbers = #tpu.dot_dimension_numbers<[1], [0], [0], [1], [0, 0, 1, 1], [], []>} : vector<256x256xbf16>, vector<256x128xbf16>, vector<256x128xf32> -> vector<256x128xf32>
    %c0_28 = arith.constant 0 : index
    %c0_29 = arith.constant 0 : index
    %47 = vector.load %arg6[%c0_28, %c0_29] : memref<1x128xf32, #tpu.memory_space<vmem>>, vector<1x128xf32>
    %48 = vector.broadcast %47 : vector<1x128xf32> to vector<256x128xf32>
    %49 = arith.addf %46, %48 : vector<256x128xf32>
    %50 = tpu.transpose %49, [1, 0] : vector<256x128xf32> -> vector<128x256xf32>
    %51 = vector.extract_strided_slice %50 {offsets = [0, 0], sizes = [4, 256], strides = [1, 1]} : vector<128x256xf32> to vector<4x256xf32>
    %cst_30 = arith.constant 5.000000e-01 : f32
    %52 = vector.broadcast %cst_30 : f32 to vector<4x256xf32>
    %53 = arith.mulf %52, %51 : vector<4x256xf32>
    %54 = math.tanh %53 : vector<4x256xf32>
    %cst_31 = arith.constant 1.000000e+00 : f32
    %55 = vector.broadcast %cst_31 : f32 to vector<4x256xf32>
    %56 = arith.addf %54, %55 : vector<4x256xf32>
    %cst_32 = arith.constant 5.000000e-01 : f32
    %57 = vector.broadcast %cst_32 : f32 to vector<4x256xf32>
    %58 = arith.mulf %57, %56 : vector<4x256xf32>
    %c0_33 = arith.constant 0 : index
    %c0_34 = arith.constant 0 : index
    %59 = vector.load %arg7[%c0_33, %c0_34] : memref<4x256xf32, #tpu.memory_space<vmem>>, vector<4x256xf32>
    tpu.vector_store %arg7[%c0_33, %c0_34], %58 {strides = array<i32>} : memref<4x256xf32, #tpu.memory_space<vmem>>, vector<4x256xf32>,
    return
  }
  func.func @transform_0(%arg0: i32) -> (i32, i32) {
    %c0_i32 = arith.constant 0 : i32
    %c0_i32_0 = arith.constant 0 : i32
    return %arg0, %c0_i32 : i32, i32
  }
  func.func @transform_1(%arg0: i32) -> (i32, i32) {
    %c0_i32 = arith.constant 0 : i32
    %c0_i32_0 = arith.constant 0 : i32
    %c0_i32_1 = arith.constant 0 : i32
    return %c0_i32, %c0_i32_0 : i32, i32
  }
  func.func @transform_2(%arg0: i32) -> (i32, i32) {
    %c0_i32 = arith.constant 0 : i32
    %c0_i32_0 = arith.constant 0 : i32
    %c0_i32_1 = arith.constant 0 : i32
    return %c0_i32, %c0_i32_0 : i32, i32
  }
  func.func @transform_3(%arg0: i32) -> (i32, i32, i32) {
    %c0_i32 = arith.constant 0 : i32
    %c0_i32_0 = arith.constant 0 : i32
    %c0_i32_1 = arith.constant 0 : i32
    %c0_i32_2 = arith.constant 0 : i32
    return %c0_i32, %c0_i32_0, %c0_i32_1 : i32, i32, i32
  }
  func.func @transform_4(%arg0: i32) -> (i32, i32) {
    %c0_i32 = arith.constant 0 : i32
    %c0_i32_0 = arith.constant 0 : i32
    %c0_i32_1 = arith.constant 0 : i32
    return %c0_i32, %c0_i32_0 : i32, i32
  }
  func.func @transform_5(%arg0: i32) -> (i32, i32) {
    %c0_i32 = arith.constant 0 : i32
    %c0_i32_0 = arith.constant 0 : i32
    %c0_i32_1 = arith.constant 0 : i32
    return %c0_i32, %c0_i32_0 : i32, i32
  }
  func.func @transform_6(%arg0: i32) -> (i32, i32) {
    %c0_i32 = arith.constant 0 : i32
    %c0_i32_0 = arith.constant 0 : i32
    return %c0_i32, %arg0 : i32, i32
  }
}

</mosaic_0001>

<bundles_post_ra>
// kernel: tpu_custom_call.1
= control target key start
LH: loop header
LB: loop body
LE: loop exit
PB: predicated region body
PF: predicated region fallthrough
CT: control target
= control target key end

     0   :  { %11 = vsyncpa [#allocation3], 0  ;;  %s3845_s0 = inlined_call_operand.vmem [shape: f32[256,2], index: 0, kind: input, shape index: {}]   ;;  %s3846_s1 = inlined_call_operand.vmem [shape: f32[2,256], index: 1, kind: input, shape index: {}]   ;;  %s3847_s2 = inlined_call_operand.vmem [shape: f32[4,256], index: 2, kind: input, shape index: {}]   ;;  %s3848_s3 = inlined_call_operand.hbm [shape: bf16[3,256,256], index: 3, kind: input, shape index: {}]   ;;  %s3849_s4 = inlined_call_operand.vmem [shape: bf16[256,128], index: 4, kind: input, shape index: {}]   ;;  %s3850_s5 = inlined_call_operand.vmem [shape: f32[1,128], index: 5, kind: input, shape index: {}]   ;;  %s3851_s6 = inlined_call_operand.hbm [shape: f32[4,256], index: 6, kind: output, shape index: {}]  }
   0x1   :  { %12 = vsyncpa [#allocation4], 0  ;;  %s3108_s21 = smov [#allocation2]   ;;  %s3060_s25 = scalar_lea.hbm %s3848_s3, 12288 }
   0x2   :  { %s24_s22 = sshll.u32 %s3108_s21, 4  ;;  %p3061_p0 = scmp.ne.s32.totalorder %s3848_s3, %s3060_s25  ;;  %s25_s22 = int_to_ptr.vmem [resolvable:$true] %s24_s22 }
   0x3   :  { %p3064_p1 = scmp.lt.u32.totalorder %s3060_s25, %s3848_s3 }
   0x5   :  { %p3066_p2 = pnand %p3064_p1, %p3061_p0 }
   0x7   :  { %3069 = shalt.err (!%p3066_p2)
}
   0x8   :  { %s3070_s30 = scalar_lea.vmem %s25_s22, 12288  ;;  %p3075_p4 = scmp.lt.s32.totalorder %s25_s22, %s25_s22 }
   0x9   :  { %p3071_p3 = scmp.ne.s32.totalorder %s25_s22, %s3070_s30  ;;  %p3076_p5 = scmp.lt.s32.totalorder %s3070_s30, %s3070_s30 }
   0xb   :  { %p3077_p6 = por %p3076_p5, %p3075_p4 }
   0xd   :  { %p3078_p7 = pnand %p3077_p6, %p3071_p3 }
   0xf   :  { %3081 = shalt.err (!%p3078_p7)
}
  0x10   :  { %s3109_s7 = smov 128   ;;  %s3110_s8 = smov 8  }
  0x11   :  { %30 = dma.hbm_to_vmem [thread:$0]  %s3848_s3, 12288, %s25_s22, [#allocation3], %s3109_s7, %s3109_s7, %s3110_s8  }
  0x12   :  { %3104 = dma.done.wait [#allocation3], 12288  }
  0x13   :  { %3105 = vsyncadd [#allocation3], 4294955008  ;;  %v3111_v0 = vmov 1   ;;  %v3112_v1 = vmov 0   ;;  %v39_v2 = vld [vmem:[%s3845_s0] sm:$0xff]  ;;  %v40_v3 = vld [vmem:[%s3845_s0 + $0x8] sm:$0xff]  ;;  %v233_v61 = vlaneseq }
  0x14   :  { %2856 = vset.pattern.permute.xlu1 %v3111_v0  ;;  %2855 = vset.pattern.permute.xlu0 %v3112_v1  ;;  %v2896_v4 = vld [vmem:[#allocation2 + $0x4] ss:$8 sps:$4 sm:$0xff]   ;;  %v41_v5 = vld [vmem:[%s3845_s0 + $0x10] sm:$0xff]  ;;  %v2898_v6 = vld [vmem:[#allocation2] ss:$8 sps:$4 sm:$0xff]  }
  0x15   :  { %310 = vperm.xlu1 %2856, %v39_v2   ;;  %74 = vperm.xlu0 %2855, %v39_v2   ;;  %v42_v7 = vld [vmem:[%s3845_s0 + $0x18] sm:$0xff]  ;;  %v2902_v10 = vld [vmem:[#allocation2 + $0x24] ss:$8 sps:$4 sm:$0xff]   ;;  %v2904_v11 = vld [vmem:[#allocation2 + $0x20] ss:$8 sps:$4 sm:$0xff]   ;;  %v234_v62 = vshrl.u32 %v233_v61, 7 }
  0x16   :  { %953 = vmatprep.subr.bf16.mxu0 %v2896_v4  ;;  %v2899_v8 = vld [vmem:[#allocation2 + $0x14] ss:$8 sps:$4 sm:$0xff]   ;;  %v2901_v9 = vld [vmem:[#allocation2 + $0x10] ss:$8 sps:$4 sm:$0xff]   ;;  %v43_v13 = vld [vmem:[%s3845_s0 + $0x20] sm:$0xff] }
  0x17   :  { %954 = vmatpush1.bf16.msra.mxu0 %v2898_v6  ;;  %v2905_v12 = vld [vmem:[#allocation2 + $0x34] ss:$8 sps:$4 sm:$0xff]   ;;  %v2907_v15 = vld [vmem:[#allocation2 + $0x30] ss:$8 sps:$4 sm:$0xff]   ;;  %v2908_v16 = vld [vmem:[#allocation2 + $0x44] ss:$8 sps:$4 sm:$0xff]  }
  0x18   :  { %955 = vmatprep.subr.bf16.mxu0 %v2899_v8  ;;  %v45_v14 = vld [vmem:[%s3845_s0 + $0x30] sm:$0xff]  ;;  %v44_v17 = vld [vmem:[%s3845_s0 + $0x28] sm:$0xff]  ;;  %v46_v25 = vld [vmem:[%s3845_s0 + $0x38] sm:$0xff]  ;;  %v3279_v63 = vsub.s32 0, %v234_v62  ;;  %v3281_v2 = vsub.s32 1, %v234_v62 }
  0x19   :  { %314 = vperm.xlu1 %2856, %v40_v3   ;;  %79 = vperm.xlu0 %2855, %v40_v3   ;;  %v2910_v18 = vld [vmem:[#allocation2 + $0x40] ss:$8 sps:$4 sm:$0xff]   ;;  %v2911_v19 = vld [vmem:[#allocation2 + $0x54] ss:$8 sps:$4 sm:$0xff]   ;;  %v2913_v20 = vld [vmem:[#allocation2 + $0x50] ss:$8 sps:$4 sm:$0xff]  }
  0x1a   :  { %v2914_v21 = vld [vmem:[#allocation2 + $0x64] ss:$8 sps:$4 sm:$0xff]   ;;  %v2916_v23 = vld [vmem:[#allocation2 + $0x60] ss:$8 sps:$4 sm:$0xff]   ;;  %v2917_v24 = vld [vmem:[#allocation2 + $0x74] ss:$8 sps:$4 sm:$0xff]  }
  0x1b   :  { %956 = vmatpush1.bf16.msra.mxu0 %v2901_v9  ;;  %v48_v22 = vld [vmem:[%s3845_s0 + $0x48] sm:$0xff]  ;;  %v49_v26 = vld [vmem:[%s3845_s0 + $0x50] sm:$0xff]  ;;  %v47_v31 = vld [vmem:[%s3845_s0 + $0x40] sm:$0xff] }
  0x1c   :  { %957 = vmatprep.subr.bf16.mxu0 %v2902_v10  ;;  %v2919_v27 = vld [vmem:[#allocation2 + $0x70] ss:$8 sps:$4 sm:$0xff]   ;;  %v2920_v28 = vld [vmem:[#allocation2 + $0x84] ss:$8 sps:$4 sm:$0xff]   ;;  %v2922_v29 = vld [vmem:[#allocation2 + $0x80] ss:$8 sps:$4 sm:$0xff]  }
  0x1d   :  { %2857 = vset.pattern.permute.xlu1 %v3112_v1  ;;  %84 = vperm.xlu0 %2855, %v41_v5   ;;  %v2923_v30 = vld [vmem:[#allocation2 + $0x94] ss:$8 sps:$4 sm:$0xff]   ;;  %v2925_v33 = vld [vmem:[#allocation2 + $0x90] ss:$8 sps:$4 sm:$0xff]   ;;  %v2926_v34 = vld [vmem:[#allocation2 + $0xa4] ss:$8 sps:$4 sm:$0xff]  }
  0x1e   :  { %89 = vperm.xlu1 %2857, %v42_v7   ;;  %v53_v32 = vld [vmem:[%s3845_s0 + $0x70] sm:$0xff]  ;;  %v52_v35 = vld [vmem:[%s3845_s0 + $0x68] sm:$0xff]  ;;  %v50_v42 = vld [vmem:[%s3845_s0 + $0x58] sm:$0xff] }
  0x1f   :  { %958 = vmatpush1.bf16.msra.mxu0 %v2904_v11  ;;  %v2928_v36 = vld [vmem:[#allocation2 + $0xa0] ss:$8 sps:$4 sm:$0xff]   ;;  %v2929_v37 = vld [vmem:[#allocation2 + $0xb4] ss:$8 sps:$4 sm:$0xff]   ;;  %v2931_v38 = vld [vmem:[#allocation2 + $0xb0] ss:$8 sps:$4 sm:$0xff]  }
  0x20   :  { %959 = vmatprep.subr.bf16.mxu0 %v2905_v12  ;;  %v2932_v39 = vld [vmem:[#allocation2 + $0xc4] ss:$8 sps:$4 sm:$0xff]   ;;  %v2934_v41 = vld [vmem:[#allocation2 + $0xc0] ss:$8 sps:$4 sm:$0xff]   ;;  %v2935_v43 = vld [vmem:[#allocation2 + $0xd4] ss:$8 sps:$4 sm:$0xff]  }
  0x21   :  { %2858 = vset.pattern.permute.xlu0 %v3111_v0  ;;  %v56_v40 = vld [vmem:[%s3845_s0 + $0x88] sm:$0xff]  ;;  %v57_v44 = vld [vmem:[%s3845_s0 + $0x90] sm:$0xff]  ;;  %v51_v49 = vld [vmem:[%s3845_s0 + $0x60] sm:$0xff] }
  0x22   :  { %2859 = vset.pattern.permute.xlu1 %v3111_v0  ;;  %318 = vperm.xlu0 %2858, %v41_v5   ;;  %v2937_v45 = vld [vmem:[#allocation2 + $0xd0] ss:$8 sps:$4 sm:$0xff]   ;;  %v2938_v46 = vld [vmem:[#allocation2 + $0xe4] ss:$8 sps:$4 sm:$0xff]   ;;  %v2940_v47 = vld [vmem:[#allocation2 + $0xe0] ss:$8 sps:$4 sm:$0xff]  }
  0x23   :  { %322 = vperm.xlu1 %2859, %v42_v7   ;;  %960 = vmatpush1.bf16.msra.mxu0 %v2907_v15  ;;  %v2941_v48 = vld [vmem:[#allocation2 + $0xf4] ss:$8 sps:$4 sm:$0xff]   ;;  %v2943_v50 = vld [vmem:[#allocation2 + $0xf0] ss:$8 sps:$4 sm:$0xff]   ;;  %v60_v52 = vld [vmem:[%s3845_s0 + $0xa8] sm:$0xff] }
  0x24   :  { %961 = vmatprep.subr.bf16.mxu0 %v2908_v16  ;;  %v61_v51 = vld [vmem:[%s3845_s0 + $0xb0] sm:$0xff]  ;;  %v54_v53 = vld [vmem:[%s3845_s0 + $0x78] sm:$0xff]  ;;  %v3244_v54 = vld [vmem:[%s3845_s0 + $0xc8] sm:$0xff] }
  0x25   :  { %v65_v55 = vld [vmem:[%s3845_s0 + $0xd0] sm:$0xff]  ;;  %v55_v56 = vld [vmem:[%s3845_s0 + $0x80] sm:$0xff]  ;;  %v3261_v57 = vld [vmem:[%s3845_s0 + $0xe8] sm:$0xff] }
  0x26   :  { %334 = vperm.xlu0 %2858, %v45_v14   ;;  %v69_v58 = vld [vmem:[%s3845_s0 + $0xf0] sm:$0xff]  ;;  %v58_v59 = vld [vmem:[%s3845_s0 + $0x98] sm:$0xff]  ;;  %v59_v60 = vld [vmem:[%s3845_s0 + $0xa0] sm:$0xff] }
  0x27   :  { %2860 = vset.pattern.permute.xlu1 %v3112_v1  ;;  %962 = vmatpush1.bf16.msra.mxu0 %v2910_v18  ;;  %v2620_v3 = vld [vmem:[%s3846_s1 + $0x1] ss:$2 sm:$0x3]  ;;  %v71_v4 = vld [vmem:[%s3846_s1] ss:$2 sm:$0x3] }
  0x28   :  { %94 = vperm.xlu1 %2860, %v43_v13   ;;  %963 = vmatprep.subr.bf16.mxu0 %v2911_v19  ;;  %v3290_v5 = vrot.slane %v2620_v3, %v3279_v63  ;;  %v3293_v6 = vrot.slane %v2620_v3, %v3281_v2  ;;  %v3296_v7 = vrot.slane %v71_v4, %v3279_v63  ;;  %v62_v9 = vld [vmem:[%s3845_s0 + $0xb8] sm:$0xff]  ;;  %v576_v11 = vld [vmem:[%s3847_s2] ss:$4 sm:$0x3] }
  0x29   :  { %v3299_v8 = vrot.slane %v71_v4, %v3281_v2 }
  0x2a   :  { %2863 = vset.pattern.permute.xlu0 %v3112_v1 }
  0x2b   :  { %99 = vperm.xlu0 %2863, %v44_v17   ;;  %964 = vmatpush1.bf16.msra.mxu0 %v2913_v20 }
  0x2c   :  { %2861 = vset.pattern.permute.xlu1 %v3111_v0  ;;  %965 = vmatprep.subr.bf16.mxu0 %v2914_v21 }
  0x2d   :  { %326 = vperm.xlu1 %2861, %v43_v13  }
  0x2f   :  { %104 = vperm.xlu0 %2863, %v45_v14   ;;  %966 = vmatpush1.bf16.msra.mxu0 %v2916_v23 }
  0x30   :  { %967 = vmatprep.subr.bf16.mxu0 %v2917_v24 }
  0x31   :  { %330 = vperm.xlu1 %2861, %v44_v17   ;;  %v3313_v17 = vrot.slane %v576_v11, %v3279_v63 }
  0x33   :  { %119 = vperm.xlu0 %2863, %v48_v22   ;;  %968 = vmatpush1.bf16.msra.mxu0 %v2919_v27 }
  0x34   :  { %969 = vmatprep.subr.bf16.mxu0 %v2920_v28 }
  0x35   :  { %2862 = vset.pattern.permute.xlu1 %v3112_v1 }
  0x36   :  { %109 = vperm.xlu1 %2862, %v46_v25  }
  0x37   :  { %124 = vperm.xlu0 %2863, %v49_v26   ;;  %970 = vmatpush1.bf16.msra.mxu0 %v2922_v29 }
  0x38   :  { %971 = vmatprep.subr.bf16.mxu0 %v2923_v30 }
  0x3a   :  { %2864 = vset.pattern.permute.xlu1 %v3111_v0 }
  0x3b   :  { %338 = vperm.xlu1 %2864, %v46_v25   ;;  %2868 = vset.pattern.permute.xlu0 %v3111_v0 }
  0x3c   :  { %350 = vperm.xlu0 %2868, %v49_v26   ;;  %972 = vmatpush1.bf16.msra.mxu0 %v2925_v33 }
  0x3d   :  { %973 = vmatprep.subr.bf16.mxu0 %v2926_v34  ;;  %v63_v34 = vld [vmem:[%s3845_s0 + $0xc0] sm:$0xff] }
  0x3f   :  { %2865 = vset.pattern.permute.xlu1 %v3112_v1 }
  0x40   :  { %114 = vperm.xlu1 %2865, %v47_v31   ;;  %366 = vperm.xlu0 %2868, %v53_v32  }
  0x41   :  { %974 = vmatpush1.bf16.msra.mxu0 %v2928_v36 }
  0x42   :  { %975 = vmatprep.subr.bf16.mxu0 %v2929_v37 }
  0x44   :  { %2866 = vset.pattern.permute.xlu1 %v3111_v0  ;;  %2873 = vset.pattern.permute.xlu0 %v3112_v1 }
  0x45   :  { %342 = vperm.xlu1 %2866, %v47_v31   ;;  %139 = vperm.xlu0 %2873, %v52_v35  }
  0x46   :  { %976 = vmatpush1.bf16.msra.mxu0 %v2931_v38 }
  0x47   :  { %977 = vmatprep.subr.bf16.mxu0 %v2932_v39 }
  0x49   :  { %346 = vperm.xlu1 %2866, %v48_v22   ;;  %144 = vperm.xlu0 %2873, %v53_v32   ;;  %v3316_v22 = vrot.slane %v576_v11, %v3281_v2 }
  0x4a   :  { %978 = vmatpush1.bf16.msra.mxu0 %v2934_v41 }
  0x4b   :  { %979 = vmatprep.subr.bf16.mxu0 %v2935_v43 }
  0x4d   :  { %2867 = vset.pattern.permute.xlu1 %v3112_v1  ;;  %159 = vperm.xlu0 %2873, %v56_v40  }
  0x4e   :  { %129 = vperm.xlu1 %2867, %v50_v42   ;;  %980 = vmatpush1.bf16.msra.mxu0 %v2937_v45 }
  0x4f   :  { %981 = vmatprep.subr.bf16.mxu0 %v2938_v46 }
  0x51   :  { %164 = vperm.xlu0 %2873, %v57_v44  }
  0x52   :  { %2869 = vset.pattern.permute.xlu1 %v3111_v0  ;;  %982 = vmatpush1.bf16.msra.mxu0 %v2940_v47 }
  0x53   :  { %354 = vperm.xlu1 %2869, %v50_v42   ;;  %983 = vmatprep.subr.bf16.mxu0 %v2941_v48 }
  0x55   :  { %2878 = vset.pattern.permute.xlu0 %v3111_v0 }
  0x56   :  { %382 = vperm.xlu0 %2878, %v57_v44   ;;  %984 = vmatpush1.bf16.msra.mxu0 %v2943_v50 }
  0x57   :  { %2870 = vset.pattern.permute.xlu1 %v3112_v1 }
  0x58   :  { %134 = vperm.xlu1 %2870, %v51_v49  }
  0x5a   :  { %398 = vperm.xlu0 %2878, %v61_v51  }
  0x5c   :  { %2871 = vset.pattern.permute.xlu1 %v3111_v0 }
  0x5d   :  { %358 = vperm.xlu1 %2871, %v51_v49  }
  0x5e   :  { %2883 = vset.pattern.permute.xlu0 %v3112_v1 }
  0x5f   :  { %179 = vperm.xlu0 %2883, %v60_v52  }
  0x61   :  { %362 = vperm.xlu1 %2871, %v52_v35  }
  0x63   :  { %184 = vperm.xlu0 %2883, %v61_v51  }
  0x65   :  { %2872 = vset.pattern.permute.xlu1 %v3112_v1 }
  0x66   :  { %149 = vperm.xlu1 %2872, %v54_v53  }
  0x67   :  { %199 = vperm.xlu0 %2883, %v3244_v54  }
  0x6a   :  { %2874 = vset.pattern.permute.xlu1 %v3111_v0 }
  0x6b   :  { %370 = vperm.xlu1 %2874, %v54_v53   ;;  %2888 = vset.pattern.permute.xlu0 %v3111_v0 }
  0x6c   :  { %414 = vperm.xlu0 %2888, %v65_v55  }
  0x6f   :  { %2875 = vset.pattern.permute.xlu1 %v3112_v1 }
  0x70   :  { %154 = vperm.xlu1 %2875, %v55_v56   ;;  %2889 = vset.pattern.permute.xlu0 %v3112_v1 }
  0x71   :  { %204 = vperm.xlu0 %2889, %v65_v55  }
  0x74   :  { %2876 = vset.pattern.permute.xlu1 %v3111_v0 }
  0x75   :  { %374 = vperm.xlu1 %2876, %v55_v56   ;;  %219 = vperm.xlu0 %2889, %v3261_v57  }
  0x79   :  { %378 = vperm.xlu1 %2876, %v56_v40   ;;  %224 = vperm.xlu0 %2889, %v69_v58  }
  0x7d   :  { %2877 = vset.pattern.permute.xlu1 %v3112_v1  ;;  %2894 = vset.pattern.permute.xlu0 %v3111_v0 }
  0x7e   :  { %169 = vperm.xlu1 %2877, %v58_v59   ;;  %430 = vperm.xlu0 %2894, %v69_v58  }
  0x82   :  { %2879 = vset.pattern.permute.xlu1 %v3111_v0 }
  0x83   :  { %386 = vperm.xlu1 %2879, %v58_v59  }
  0x87   :  { %2880 = vset.pattern.permute.xlu1 %v3112_v1 }
  0x88   :  { %174 = vperm.xlu1 %2880, %v59_v60  }
  0x8c   :  { %2881 = vset.pattern.permute.xlu1 %v3111_v0 }
  0x8d   :  { %390 = vperm.xlu1 %2881, %v59_v60  }
  0x91   :  { %394 = vperm.xlu1 %2881, %v60_v52  }
  0x94   :  { %v311_v10 = vpop.permute.xlu1 %310  ;;  %v75_v12 = vpop.permute.xlu0 %74 }
  0x95   :  { %v448_v13 = vmul.f32 %v3290_v5, %v311_v10  ;;  %v449_v14 = vmul.f32 %v3293_v6, %v311_v10  ;;  %v243_v15 = vmul.f32 %v3296_v7, %v75_v12  ;;  %v244_v16 = vmul.f32 %v3299_v8, %v75_v12  ;;  %2882 = vset.pattern.permute.xlu1 %v3112_v1 }
  0x96   :  { %189 = vperm.xlu1 %2882, %v62_v9  }
  0x97   :  { %v512_v18 = vadd.f32 %v448_v13, %v243_v15  ;;  %v513_v19 = vadd.f32 %v449_v14, %v244_v16  ;;  %v66_v13 = vld [vmem:[%s3845_s0 + $0xd8] sm:$0xff] }
  0x98   :  { %v315_v20 = vpop.permute.xlu1 %314  ;;  %v80_v21 = vpop.permute.xlu0 %79 }
  0x99   :  { %v450_v23 = vmul.f32 %v3290_v5, %v315_v20  ;;  %v451_v24 = vmul.f32 %v3293_v6, %v315_v20  ;;  %v245_v25 = vmul.f32 %v3296_v7, %v80_v21  ;;  %v246_v26 = vmul.f32 %v3299_v8, %v80_v21 }
  0x9a   :  { %2884 = vset.pattern.permute.xlu1 %v3111_v0  ;;  %v588_v27 = vadd.f32 %v3313_v17, %v512_v18  ;;  %v589_v31 = vadd.f32 %v3316_v22, %v513_v19 }
  0x9b   :  { %v514_v28 = vadd.f32 %v450_v23, %v245_v25  ;;  %402 = vperm.xlu1 %2884, %v62_v9   ;;  %v515_v29 = vadd.f32 %v451_v24, %v246_v26 }
  0x9c   :  { %v85_v30 = vpop.permute.xlu0 %84  ;;  %v652_v36 = vmax.f32 %v588_v27, 0.0  ;;  %v653_v40 = vmax.f32 %v589_v31, 0.0 }
  0x9d   :  { %v590_v32 = vadd.f32 %v3313_v17, %v514_v28  ;;  %v90_v33 = vpop.permute.xlu1 %89  ;;  %v591_v35 = vadd.f32 %v3316_v22, %v515_v29  ;;  %v247_v38 = vmul.f32 %v3296_v7, %v85_v30  ;;  %v248_v39 = vmul.f32 %v3299_v8, %v85_v30 }
  0x9e   :  { %v249_v48 = vmul.f32 %v3296_v7, %v90_v33  ;;  %v250_v49 = vmul.f32 %v3299_v8, %v90_v33 }
  0x9f   :  { %2885 = vset.pattern.permute.xlu1 %v3112_v1  ;;  %v654_v37 = vmax.f32 %v590_v32, 0.0  ;;  %v655_v41 = vmax.f32 %v591_v35, 0.0 }
  0xa0   :  { %194 = vperm.xlu1 %2885, %v63_v34  }
  0xa1   :  { %v319_v42 = vpop.permute.xlu0 %318  ;;  %v716_v43 = vpack.c.bf16 %v654_v37, %v652_v36  ;;  %v717_v47 = vpack.c.bf16 %v655_v41, %v653_v40  ;;  %v67_v41 = vld [vmem:[%s3845_s0 + $0xe0] sm:$0xff] }
  0xa2   :  { %v323_v44 = vpop.permute.xlu1 %322  ;;  %v452_v45 = vmul.f32 %v3290_v5, %v319_v42  ;;  %v453_v46 = vmul.f32 %v3293_v6, %v319_v42 }
  0xa3   :  { %v454_v50 = vmul.f32 %v3290_v5, %v323_v44  ;;  %v455_v51 = vmul.f32 %v3293_v6, %v323_v44  ;;  %985 = vmatprep.mubr.bf16.mxu0 %v717_v47 }
  0xa4   :  { %v516_v52 = vadd.f32 %v452_v45, %v247_v38  ;;  %v517_v53 = vadd.f32 %v453_v46, %v248_v39  ;;  %2886 = vset.pattern.permute.xlu1 %v3111_v0  ;;  %986 = vmatmul.mubr.bf16.vlgmr.msra.gmra.mrb[0].mxu0 %v716_v43 }
  0xa5   :  { %v518_v55 = vadd.f32 %v454_v50, %v249_v48  ;;  %v519_v56 = vadd.f32 %v455_v51, %v250_v49  ;;  %406 = vperm.xlu1 %2886, %v63_v34   ;;  %v335_v58 = vpop.permute.xlu0 %334 }
  0xa6   :  { %v592_v59 = vadd.f32 %v3313_v17, %v516_v52  ;;  %v593_v60 = vadd.f32 %v3316_v22, %v517_v53  ;;  %v460_v30 = vmul.f32 %v3290_v5, %v335_v58  ;;  %v461_v31 = vmul.f32 %v3293_v6, %v335_v58 }
  0xa7   :  { %v594_v61 = vadd.f32 %v3313_v17, %v518_v55  ;;  %v595_v62 = vadd.f32 %v3316_v22, %v519_v56  ;;  %v95_v3 = vpop.permute.xlu1 %94 }
  0xa8   :  { %v657_v4 = vmax.f32 %v593_v60, 0.0  ;;  %v656_v9 = vmax.f32 %v592_v59, 0.0  ;;  %v251_v16 = vmul.f32 %v3296_v7, %v95_v3  ;;  %v252_v19 = vmul.f32 %v3299_v8, %v95_v3 }
  0xa9   :  { %410 = vperm.xlu1 %2886, %v3244_v54   ;;  %v659_v10 = vmax.f32 %v595_v62, 0.0  ;;  %v658_v11 = vmax.f32 %v594_v61, 0.0 }
  0xaa   :  { %v100_v15 = vpop.permute.xlu0 %99 }
  0xab   :  { %v719_v12 = vpack.c.bf16 %v659_v10, %v657_v4  ;;  %v718_v14 = vpack.c.bf16 %v658_v11, %v656_v9  ;;  %v253_v24 = vmul.f32 %v3296_v7, %v100_v15  ;;  %v254_v25 = vmul.f32 %v3299_v8, %v100_v15  ;;  %v2946_v15 = vld [vmem:[#allocation2 + $0x100] ss:$8 sps:$4 sm:$0xff]  }
  0xac   :  { %v327_v18 = vpop.permute.xlu1 %326 }
  0xad   :  { %v456_v20 = vmul.f32 %v3290_v5, %v327_v18  ;;  %v457_v21 = vmul.f32 %v3293_v6, %v327_v18  ;;  %2887 = vset.pattern.permute.xlu1 %v3112_v1  ;;  %995 = vmatprep.mubr.bf16.mxu0 %v719_v12  ;;  %v70_v18 = vld [vmem:[%s3845_s0 + $0xf8] sm:$0xff] }
  0xae   :  { %209 = vperm.xlu1 %2887, %v66_v13   ;;  %996 = vmatmul.mubr.bf16.gmra.mrb[4].mxu0 %v718_v14  ;;  %v105_v26 = vpop.permute.xlu0 %104  ;;  %v2944_v14 = vld [vmem:[#allocation2 + $0x104] ss:$8 sps:$4 sm:$0xff]  }
  0xaf   :  { %v520_v54 = vadd.f32 %v456_v20, %v251_v16  ;;  %v521_v23 = vadd.f32 %v457_v21, %v252_v19  ;;  %v255_v32 = vmul.f32 %v3296_v7, %v105_v26  ;;  %v256_v33 = vmul.f32 %v3299_v8, %v105_v26  ;;  %1448 = vmatprep.subr.bf16.mxu1 %v2944_v14  ;;  %v2950_v26 = vld [vmem:[#allocation2 + $0x124] ss:$8 sps:$4 sm:$0xff]   ;;  %v2961_v14 = vld [vmem:[#allocation2 + $0x150] ss:$8 sps:$4 sm:$0xff]  }
  0xb0   :  { %v331_v27 = vpop.permute.xlu1 %330  ;;  %1449 = vmatpush1.bf16.msra.mxu1 %v2946_v15  ;;  %v2962_v15 = vld [vmem:[#allocation2 + $0x164] ss:$8 sps:$4 sm:$0xff]  }
  0xb1   :  { %v458_v28 = vmul.f32 %v3290_v5, %v331_v27  ;;  %v459_v29 = vmul.f32 %v3293_v6, %v331_v27  ;;  %v596_v34 = vadd.f32 %v3313_v17, %v520_v54  ;;  %v597_v35 = vadd.f32 %v3316_v22, %v521_v23 }
  0xb2   :  { %2890 = vset.pattern.permute.xlu1 %v3111_v0  ;;  %v524_v42 = vadd.f32 %v460_v30, %v255_v32  ;;  %v525_v43 = vadd.f32 %v461_v31, %v256_v33  ;;  %v120_v61 = vpop.permute.xlu0 %119 }
  0xb3   :  { %v522_v36 = vadd.f32 %v458_v28, %v253_v24  ;;  %v523_v37 = vadd.f32 %v459_v29, %v254_v25  ;;  %418 = vperm.xlu1 %2890, %v66_v13   ;;  %v661_v44 = vmax.f32 %v597_v35, 0.0  ;;  %v660_v46 = vmax.f32 %v596_v34, 0.0  ;;  %v2947_v24 = vld [vmem:[#allocation2 + $0x114] ss:$8 sps:$4 sm:$0xff]   ;;  %v2949_v25 = vld [vmem:[#allocation2 + $0x110] ss:$8 sps:$4 sm:$0xff]  }
  0xb4   :  { %v600_v51 = vadd.f32 %v3313_v17, %v524_v42  ;;  %v601_v52 = vadd.f32 %v3316_v22, %v525_v43  ;;  %v261_v29 = vmul.f32 %v3296_v7, %v120_v61  ;;  %v262_v30 = vmul.f32 %v3299_v8, %v120_v61  ;;  %1450 = vmatprep.subr.bf16.mxu1 %v2947_v24  ;;  %v2965_v24 = vld [vmem:[#allocation2 + $0x174] ss:$8 sps:$4 sm:$0xff]  }
  0xb5   :  { %v598_v38 = vadd.f32 %v3313_v17, %v522_v36  ;;  %v599_v39 = vadd.f32 %v3316_v22, %v523_v37  ;;  %v110_v40 = vpop.permute.xlu1 %109  ;;  %1451 = vmatpush1.bf16.msra.mxu1 %v2949_v25 }
  0xb6   :  { %v257_v53 = vmul.f32 %v3296_v7, %v110_v40  ;;  %v258_v55 = vmul.f32 %v3299_v8, %v110_v40  ;;  %v665_v9 = vmax.f32 %v601_v52, 0.0  ;;  %v664_v10 = vmax.f32 %v600_v51, 0.0  ;;  %v125_v13 = vpop.permute.xlu0 %124  ;;  %1452 = vmatprep.subr.bf16.mxu1 %v2950_v26 }
  0xb7   :  { %2891 = vset.pattern.permute.xlu1 %v3112_v1  ;;  %v663_v45 = vmax.f32 %v599_v39, 0.0  ;;  %v662_v47 = vmax.f32 %v598_v38, 0.0  ;;  %v263_v34 = vmul.f32 %v3296_v7, %v125_v13  ;;  %v264_v35 = vmul.f32 %v3299_v8, %v125_v13  ;;  %v2952_v38 = vld [vmem:[#allocation2 + $0x120] ss:$8 sps:$4 sm:$0xff]   ;;  %v2959_v13 = vld [vmem:[#allocation2 + $0x154] ss:$8 sps:$4 sm:$0xff]  }
  0xb8   :  { %214 = vperm.xlu1 %2891, %v67_v41  }
  0xb9   :  { %v721_v48 = vpack.c.bf16 %v663_v45, %v661_v44  ;;  %v720_v49 = vpack.c.bf16 %v662_v47, %v660_v46  ;;  %1453 = vmatpush1.bf16.msra.mxu1 %v2952_v38  ;;  %v2953_v45 = vld [vmem:[#allocation2 + $0x134] ss:$8 sps:$4 sm:$0xff]  }
  0xba   :  { %v339_v50 = vpop.permute.xlu1 %338  ;;  %1454 = vmatprep.subr.bf16.mxu1 %v2953_v45 }
  0xbb   :  { %v462_v56 = vmul.f32 %v3290_v5, %v339_v50  ;;  %v463_v58 = vmul.f32 %v3293_v6, %v339_v50  ;;  %1005 = vmatprep.mubr.bf16.mxu0 %v721_v48  ;;  %v351_v31 = vpop.permute.xlu0 %350  ;;  %v2955_v48 = vld [vmem:[#allocation2 + $0x130] ss:$8 sps:$4 sm:$0xff]  }
  0xbc   :  { %2892 = vset.pattern.permute.xlu1 %v3111_v0  ;;  %1006 = vmatmul.mubr.bf16.gmra.mrb[8].mxu0 %v720_v49  ;;  %v468_v36 = vmul.f32 %v3290_v5, %v351_v31  ;;  %v469_v37 = vmul.f32 %v3293_v6, %v351_v31 }
  0xbd   :  { %v526_v59 = vadd.f32 %v462_v56, %v257_v53  ;;  %v527_v60 = vadd.f32 %v463_v58, %v258_v55  ;;  %422 = vperm.xlu1 %2892, %v67_v41   ;;  %v2956_v53 = vld [vmem:[#allocation2 + $0x144] ss:$8 sps:$4 sm:$0xff]   ;;  %1455 = vmatpush1.bf16.msra.mxu1 %v2955_v48  ;;  %v2958_v55 = vld [vmem:[#allocation2 + $0x140] ss:$8 sps:$4 sm:$0xff]  }
  0xbe   :  { %v532_v46 = vadd.f32 %v468_v36, %v263_v34  ;;  %v533_v47 = vadd.f32 %v469_v37, %v264_v35  ;;  %1456 = vmatprep.subr.bf16.mxu1 %v2956_v53 }
  0xbf   :  { %v602_v62 = vadd.f32 %v3313_v17, %v526_v59  ;;  %v603_v3 = vadd.f32 %v3316_v22, %v527_v60  ;;  %v115_v4 = vpop.permute.xlu1 %114 }
  0xc0   :  { %v259_v20 = vmul.f32 %v3296_v7, %v115_v4  ;;  %v260_v54 = vmul.f32 %v3299_v8, %v115_v4  ;;  %v608_v60 = vadd.f32 %v3313_v17, %v532_v46  ;;  %v609_v61 = vadd.f32 %v3316_v22, %v533_v47 }
  0xc1   :  { %426 = vperm.xlu1 %2892, %v3261_v57   ;;  %v667_v11 = vmax.f32 %v603_v3, 0.0  ;;  %v666_v12 = vmax.f32 %v602_v62, 0.0  ;;  %1457 = vmatpush1.bf16.msra.mxu1 %v2958_v55 }
  0xc2   :  { %1458 = vmatprep.subr.bf16.mxu1 %v2959_v13 }
  0xc3   :  { %v723_v16 = vpack.c.bf16 %v667_v11, %v665_v9  ;;  %v722_v19 = vpack.c.bf16 %v666_v12, %v664_v10  ;;  %v367_v12 = vpop.permute.xlu0 %366 }
  0xc4   :  { %v343_v21 = vpop.permute.xlu1 %342 }
  0xc5   :  { %v464_v57 = vmul.f32 %v3290_v5, %v343_v21  ;;  %v465_v23 = vmul.f32 %v3293_v6, %v343_v21  ;;  %2893 = vset.pattern.permute.xlu1 %v3112_v1  ;;  %1015 = vmatprep.mubr.bf16.mxu0 %v723_v16  ;;  %v672_v21 = vmax.f32 %v608_v60, 0.0 }
  0xc6   :  { %229 = vperm.xlu1 %2893, %v70_v18   ;;  %1016 = vmatmul.mubr.bf16.gmra.mrb[12].mxu0 %v722_v19 }
  0xc7   :  { %v528_v27 = vadd.f32 %v464_v57, %v259_v20  ;;  %v529_v28 = vadd.f32 %v465_v23, %v260_v54  ;;  %v673_v20 = vmax.f32 %v609_v61, 0.0  ;;  %1459 = vmatpush1.bf16.msra.mxu1 %v2961_v14  ;;  %v2964_v54 = vld [vmem:[#allocation2 + $0x160] ss:$8 sps:$4 sm:$0xff]  }
  0xc8   :  { %v347_v32 = vpop.permute.xlu1 %346  ;;  %1460 = vmatprep.subr.bf16.mxu1 %v2962_v15 }
  0xc9   :  { %v466_v33 = vmul.f32 %v3290_v5, %v347_v32  ;;  %v467_v1 = vmul.f32 %v3293_v6, %v347_v32  ;;  %v604_v39 = vadd.f32 %v3313_v17, %v528_v27  ;;  %v605_v40 = vadd.f32 %v3316_v22, %v529_v28  ;;  %v140_v27 = vpop.permute.xlu0 %139 }
  0xca   :  { %2895 = vset.pattern.permute.xlu1 %v3111_v0  ;;  %v269_v36 = vmul.f32 %v3296_v7, %v140_v27  ;;  %v270_v37 = vmul.f32 %v3299_v8, %v140_v27 }
  0xcb   :  { %v530_v41 = vadd.f32 %v466_v33, %v261_v29  ;;  %v531_v42 = vadd.f32 %v467_v1, %v262_v30  ;;  %434 = vperm.xlu1 %2895, %v70_v18   ;;  %v669_v49 = vmax.f32 %v605_v40, 0.0  ;;  %v668_v51 = vmax.f32 %v604_v39, 0.0  ;;  %1461 = vmatpush1.bf16.msra.mxu1 %v2964_v54  ;;  %v2967_v30 = vld [vmem:[#allocation2 + $0x170] ss:$8 sps:$4 sm:$0xff]   ;;  %v2968_v1 = vld [vmem:[#allocation2 + $0x184] ss:$8 sps:$4 sm:$0xff]  }
  0xcc   :  { %1462 = vmatprep.subr.bf16.mxu1 %v2965_v24  ;;  %v2970_v40 = vld [vmem:[#allocation2 + $0x180] ss:$8 sps:$4 sm:$0xff]  }
  0xcd   :  { %v606_v43 = vadd.f32 %v3313_v17, %v530_v41  ;;  %v607_v0 = vadd.f32 %v3316_v22, %v531_v42  ;;  %v130_v44 = vpop.permute.xlu1 %129  ;;  %v145_v38 = vpop.permute.xlu0 %144 }
  0xce   :  { %v265_v62 = vmul.f32 %v3296_v7, %v130_v44  ;;  %v266_v3 = vmul.f32 %v3299_v8, %v130_v44  ;;  %v477_v44 = vmul.f32 %v3293_v6, %v367_v12  ;;  %v271_v45 = vmul.f32 %v3296_v7, %v145_v38 }
  0xcf   :  { %v671_v50 = vmax.f32 %v607_v0, 0.0  ;;  %v670_v52 = vmax.f32 %v606_v43, 0.0  ;;  %1463 = vmatpush1.bf16.msra.mxu1 %v2967_v30  ;;  %v2971_v43 = vld [vmem:[#allocation2 + $0x194] ss:$8 sps:$4 sm:$0xff]   ;;  %v476_v0 = vmul.f32 %v3290_v5, %v367_v12  ;;  %v272_v46 = vmul.f32 %v3299_v8, %v145_v38 }
  0xd0   :  { %1464 = vmatprep.subr.bf16.mxu1 %v2968_v1 }
  0xd1   :  { %v725_v56 = vpack.c.bf16 %v671_v50, %v669_v49  ;;  %v724_v58 = vpack.c.bf16 %v670_v52, %v668_v51  ;;  %v2973_v51 = vld [vmem:[#allocation2 + $0x190] ss:$8 sps:$4 sm:$0xff]  }
  0xd2   :  { %v355_v59 = vpop.permute.xlu1 %354 }
  0xd3   :  { %v470_v4 = vmul.f32 %v3290_v5, %v355_v59  ;;  %v471_v9 = vmul.f32 %v3293_v6, %v355_v59  ;;  %1025 = vmatprep.mubr.bf16.mxu0 %v725_v56  ;;  %1465 = vmatpush1.bf16.msra.mxu1 %v2970_v40  ;;  %v2974_v56 = vld [vmem:[#allocation2 + $0x1a4] ss:$8 sps:$4 sm:$0xff]   ;;  %v541_v59 = vadd.f32 %v477_v44, %v272_v46  ;;  %v2985_v40 = vld [vmem:[#allocation2 + $0x1d0] ss:$8 sps:$4 sm:$0xff]  }
  0xd4   :  { %1026 = vmatmul.mubr.bf16.gmra.mrb[16].mxu0 %v724_v58  ;;  %1466 = vmatprep.subr.bf16.mxu1 %v2971_v43  ;;  %v540_v58 = vadd.f32 %v476_v0, %v271_v45 }
  0xd5   :  { %v534_v10 = vadd.f32 %v470_v4, %v265_v62  ;;  %v535_v11 = vadd.f32 %v471_v9, %v266_v3  ;;  %v2976_v4 = vld [vmem:[#allocation2 + $0x1a0] ss:$8 sps:$4 sm:$0xff]   ;;  %v617_v14 = vadd.f32 %v3316_v22, %v541_v59 }
  0xd6   :  { %v616_v13 = vadd.f32 %v3313_v17, %v540_v58 }
  0xd7   :  { %v610_v16 = vadd.f32 %v3313_v17, %v534_v10  ;;  %v611_v18 = vadd.f32 %v3316_v22, %v535_v11  ;;  %v135_v19 = vpop.permute.xlu1 %134  ;;  %1467 = vmatpush1.bf16.msra.mxu1 %v2973_v51  ;;  %v2977_v11 = vld [vmem:[#allocation2 + $0x1b4] ss:$8 sps:$4 sm:$0xff]   ;;  %v681_v27 = vmax.f32 %v617_v14, 0.0 }
  0xd8   :  { %v267_v28 = vmul.f32 %v3296_v7, %v135_v19  ;;  %v268_v31 = vmul.f32 %v3299_v8, %v135_v19  ;;  %1468 = vmatprep.subr.bf16.mxu1 %v2974_v56 }
  0xd9   :  { %v675_v57 = vmax.f32 %v611_v18, 0.0  ;;  %v674_v23 = vmax.f32 %v610_v16, 0.0 }
  0xdb   :  { %v727_v25 = vpack.c.bf16 %v675_v57, %v673_v20  ;;  %v726_v26 = vpack.c.bf16 %v674_v23, %v672_v21  ;;  %1469 = vmatpush1.bf16.msra.mxu1 %v2976_v4  ;;  %v2979_v20 = vld [vmem:[#allocation2 + $0x1b0] ss:$8 sps:$4 sm:$0xff]   ;;  %v160_v57 = vpop.permute.xlu0 %159  ;;  %v2980_v23 = vld [vmem:[#allocation2 + $0x1c4] ss:$8 sps:$4 sm:$0xff]  }
  0xdc   :  { %v359_v29 = vpop.permute.xlu1 %358  ;;  %1470 = vmatprep.subr.bf16.mxu1 %v2977_v11  ;;  %v277_v43 = vmul.f32 %v3296_v7, %v160_v57  ;;  %v278_v0 = vmul.f32 %v3299_v8, %v160_v57 }
  0xdd   :  { %v472_v32 = vmul.f32 %v3290_v5, %v359_v29  ;;  %v473_v33 = vmul.f32 %v3293_v6, %v359_v29  ;;  %1035 = vmatprep.mubr.bf16.mxu0 %v727_v25  ;;  %v2982_v29 = vld [vmem:[#allocation2 + $0x1c0] ss:$8 sps:$4 sm:$0xff]  }
  0xde   :  { %1036 = vmatmul.mubr.bf16.gmra.mrb[20].mxu0 %v726_v26 }
  0xdf   :  { %v536_v34 = vadd.f32 %v472_v32, %v267_v28  ;;  %v537_v35 = vadd.f32 %v473_v33, %v268_v31  ;;  %v680_v28 = vmax.f32 %v616_v13, 0.0  ;;  %1471 = vmatpush1.bf16.msra.mxu1 %v2979_v20  ;;  %v165_v32 = vpop.permute.xlu0 %164  ;;  %v2983_v33 = vld [vmem:[#allocation2 + $0x1d4] ss:$8 sps:$4 sm:$0xff]  }
  0xe0   :  { %v363_v39 = vpop.permute.xlu1 %362  ;;  %1472 = vmatprep.subr.bf16.mxu1 %v2980_v23 }
  0xe1   :  { %v474_v41 = vmul.f32 %v3290_v5, %v363_v39  ;;  %v475_v42 = vmul.f32 %v3293_v6, %v363_v39  ;;  %v612_v47 = vadd.f32 %v3313_v17, %v536_v34  ;;  %v613_v48 = vadd.f32 %v3316_v22, %v537_v35 }
  0xe3   :  { %v538_v49 = vadd.f32 %v474_v41, %v269_v36  ;;  %v539_v50 = vadd.f32 %v475_v42, %v270_v37  ;;  %v677_v60 = vmax.f32 %v613_v48, 0.0  ;;  %v676_v62 = vmax.f32 %v612_v47, 0.0  ;;  %1473 = vmatpush1.bf16.msra.mxu1 %v2982_v29  ;;  %v383_v44 = vpop.permute.xlu0 %382  ;;  %v2986_v48 = vld [vmem:[#allocation2 + $0x1e4] ss:$8 sps:$4 sm:$0xff]  }
  0xe4   :  { %1474 = vmatprep.subr.bf16.mxu1 %v2983_v33  ;;  %v484_v51 = vmul.f32 %v3290_v5, %v383_v44 }
  0xe5   :  { %v614_v52 = vadd.f32 %v3313_v17, %v538_v49  ;;  %v615_v53 = vadd.f32 %v3316_v22, %v539_v50  ;;  %v150_v55 = vpop.permute.xlu1 %149  ;;  %v279_v49 = vmul.f32 %v3296_v7, %v165_v32  ;;  %v280_v50 = vmul.f32 %v3299_v8, %v165_v32 }
  0xe6   :  { %v273_v15 = vmul.f32 %v3296_v7, %v150_v55  ;;  %v274_v16 = vmul.f32 %v3299_v8, %v150_v55 }
  0xe7   :  { %v679_v61 = vmax.f32 %v615_v53, 0.0  ;;  %v678_v3 = vmax.f32 %v614_v52, 0.0  ;;  %1475 = vmatpush1.bf16.msra.mxu1 %v2985_v40  ;;  %v485_v52 = vmul.f32 %v3293_v6, %v383_v44  ;;  %v2988_v53 = vld [vmem:[#allocation2 + $0x1e0] ss:$8 sps:$4 sm:$0xff]   ;;  %v548_v4 = vadd.f32 %v484_v51, %v279_v49 }
  0xe8   :  { %1476 = vmatprep.subr.bf16.mxu1 %v2986_v48 }
  0xe9   :  { %v729_v9 = vpack.c.bf16 %v679_v61, %v677_v60  ;;  %v728_v10 = vpack.c.bf16 %v678_v3, %v676_v62  ;;  %v2989_v3 = vld [vmem:[#allocation2 + $0x1f4] ss:$8 sps:$4 sm:$0xff]  }
  0xea   :  { %v371_v12 = vpop.permute.xlu1 %370 }
  0xeb   :  { %v478_v18 = vmul.f32 %v3290_v5, %v371_v12  ;;  %v479_v19 = vmul.f32 %v3293_v6, %v371_v12  ;;  %1045 = vmatprep.mubr.bf16.mxu0 %v729_v9  ;;  %1477 = vmatpush1.bf16.msra.mxu1 %v2988_v53  ;;  %v549_v9 = vadd.f32 %v485_v52, %v280_v50 }
  0xec   :  { %1046 = vmatmul.mubr.bf16.gmra.mrb[24].mxu0 %v728_v10  ;;  %v2991_v10 = vld [vmem:[#allocation2 + $0x1f0] ss:$8 sps:$4 sm:$0xff]   ;;  %1478 = vmatprep.subr.bf16.mxu1 %v2989_v3 }
  0xed   :  { %v542_v21 = vadd.f32 %v478_v18, %v273_v15  ;;  %v543_v54 = vadd.f32 %v479_v19, %v274_v16  ;;  %v624_v19 = vadd.f32 %v3313_v17, %v548_v4  ;;  %v625_v20 = vadd.f32 %v3316_v22, %v549_v9 }
  0xef   :  { %v618_v24 = vadd.f32 %v3313_v17, %v542_v21  ;;  %v619_v25 = vadd.f32 %v3316_v22, %v543_v54  ;;  %v155_v26 = vpop.permute.xlu1 %154  ;;  %1479 = vmatpush1.bf16.msra.mxu1 %v2991_v10 }
  0xf0   :  { %v275_v36 = vmul.f32 %v3296_v7, %v155_v26  ;;  %v276_v37 = vmul.f32 %v3299_v8, %v155_v26  ;;  %v399_v26 = vpop.permute.xlu0 %398 }
  0xf1   :  { %v683_v30 = vmax.f32 %v619_v25, 0.0  ;;  %v682_v31 = vmax.f32 %v618_v24, 0.0  ;;  %v492_v48 = vmul.f32 %v3290_v5, %v399_v26  ;;  %v493_v49 = vmul.f32 %v3293_v6, %v399_v26 }
  0xf3   :  { %v731_v1 = vpack.c.bf16 %v683_v30, %v681_v27  ;;  %v730_v34 = vpack.c.bf16 %v682_v31, %v680_v28  ;;  %v689_v30 = vmax.f32 %v625_v20, 0.0  ;;  %v688_v31 = vmax.f32 %v624_v19, 0.0 }
  0xf4   :  { %v375_v35 = vpop.permute.xlu1 %374 }
  0xf5   :  { %v480_v38 = vmul.f32 %v3290_v5, %v375_v35  ;;  %v481_v39 = vmul.f32 %v3293_v6, %v375_v35  ;;  %1055 = vmatprep.mubr.bf16.mxu0 %v731_v1  ;;  %v180_v35 = vpop.permute.xlu0 %179 }
  0xf6   :  { %1056 = vmatmul.mubr.bf16.gmra.mrb[28].mxu0 %v730_v34 }
  0xf7   :  { %v544_v41 = vadd.f32 %v480_v38, %v275_v36  ;;  %v545_v42 = vadd.f32 %v481_v39, %v276_v37 }
  0xf8   :  { %v379_v45 = vpop.permute.xlu1 %378 }
  0xf9   :  { %v482_v46 = vmul.f32 %v3290_v5, %v379_v45  ;;  %v483_v47 = vmul.f32 %v3293_v6, %v379_v45  ;;  %v620_v55 = vadd.f32 %v3313_v17, %v544_v41  ;;  %v621_v56 = vadd.f32 %v3316_v22, %v545_v42  ;;  %v185_v44 = vpop.permute.xlu0 %184 }
  0xfa   :  { %v287_v50 = vmul.f32 %v3296_v7, %v185_v44  ;;  %v288_v51 = vmul.f32 %v3299_v8, %v185_v44 }
  0xfb   :  { %v546_v58 = vadd.f32 %v482_v46, %v277_v43  ;;  %v547_v59 = vadd.f32 %v483_v47, %v278_v0  ;;  %v685_v11 = vmax.f32 %v621_v56, 0.0  ;;  %v684_v13 = vmax.f32 %v620_v55, 0.0 }
  0xfc   :  { %v285_v43 = vmul.f32 %v3296_v7, %v180_v35  ;;  %v286_v0 = vmul.f32 %v3299_v8, %v180_v35 }
  0xfd   :  { %v622_v60 = vadd.f32 %v3313_v17, %v546_v58  ;;  %v623_v61 = vadd.f32 %v3316_v22, %v547_v59  ;;  %v170_v62 = vpop.permute.xlu1 %169 }
  0xfe   :  { %v281_v21 = vmul.f32 %v3296_v7, %v170_v62  ;;  %v282_v54 = vmul.f32 %v3299_v8, %v170_v62  ;;  %v557_v62 = vadd.f32 %v493_v49, %v288_v51 }
  0xff   :  { %v687_v12 = vmax.f32 %v623_v61, 0.0  ;;  %v686_v14 = vmax.f32 %v622_v60, 0.0  ;;  %v556_v61 = vadd.f32 %v492_v48, %v287_v50 }
 0x101   :  { %v733_v15 = vpack.c.bf16 %v687_v12, %v685_v11  ;;  %v732_v16 = vpack.c.bf16 %v686_v14, %v684_v13  ;;  %v632_v13 = vadd.f32 %v3313_v17, %v556_v61  ;;  %v633_v14 = vadd.f32 %v3316_v22, %v557_v62 }
 0x102   :  { %v387_v18 = vpop.permute.xlu1 %386 }
 0x103   :  { %v486_v57 = vmul.f32 %v3290_v5, %v387_v18  ;;  %v487_v23 = vmul.f32 %v3293_v6, %v387_v18  ;;  %1065 = vmatprep.mubr.bf16.mxu0 %v733_v15  ;;  %v697_v26 = vmax.f32 %v633_v14, 0.0 }
 0x104   :  { %1066 = vmatmul.mubr.bf16.gmra.mrb[32].mxu0 %v732_v16 }
 0x105   :  { %v550_v24 = vadd.f32 %v486_v57, %v281_v21  ;;  %v551_v25 = vadd.f32 %v487_v23, %v282_v54 }
 0x107   :  { %v626_v27 = vadd.f32 %v3313_v17, %v550_v24  ;;  %v627_v28 = vadd.f32 %v3316_v22, %v551_v25  ;;  %v175_v29 = vpop.permute.xlu1 %174  ;;  %v200_v25 = vpop.permute.xlu0 %199 }
 0x108   :  { %v283_v37 = vmul.f32 %v3296_v7, %v175_v29  ;;  %v284_v38 = vmul.f32 %v3299_v8, %v175_v29 }
 0x109   :  { %v691_v32 = vmax.f32 %v627_v28, 0.0  ;;  %v690_v33 = vmax.f32 %v626_v27, 0.0  ;;  %v696_v27 = vmax.f32 %v632_v13, 0.0 }
 0x10b   :  { %v735_v1 = vpack.c.bf16 %v691_v32, %v689_v30  ;;  %v734_v34 = vpack.c.bf16 %v690_v33, %v688_v31  ;;  %v415_v32 = vpop.permute.xlu0 %414 }
 0x10c   :  { %v391_v36 = vpop.permute.xlu1 %390  ;;  %v500_v44 = vmul.f32 %v3290_v5, %v415_v32 }
 0x10d   :  { %v488_v39 = vmul.f32 %v3290_v5, %v391_v36  ;;  %v489_v40 = vmul.f32 %v3293_v6, %v391_v36  ;;  %1075 = vmatprep.mubr.bf16.mxu0 %v735_v1 }
 0x10e   :  { %1076 = vmatmul.mubr.bf16.gmra.mrb[36].mxu0 %v734_v34 }
 0x10f   :  { %v552_v41 = vadd.f32 %v488_v39, %v283_v37  ;;  %v553_v42 = vadd.f32 %v489_v40, %v284_v38  ;;  %v293_v40 = vmul.f32 %v3296_v7, %v200_v25 }
 0x110   :  { %v395_v45 = vpop.permute.xlu1 %394 }
 0x111   :  { %v490_v46 = vmul.f32 %v3290_v5, %v395_v45  ;;  %v491_v47 = vmul.f32 %v3293_v6, %v395_v45  ;;  %v628_v52 = vadd.f32 %v3313_v17, %v552_v41  ;;  %v629_v53 = vadd.f32 %v3316_v22, %v553_v42 }
 0x112   :  { %v294_v41 = vmul.f32 %v3299_v8, %v200_v25  ;;  %v501_v45 = vmul.f32 %v3293_v6, %v415_v32 }
 0x113   :  { %v554_v55 = vadd.f32 %v490_v46, %v285_v43  ;;  %v555_v56 = vadd.f32 %v491_v47, %v286_v0  ;;  %v693_v3 = vmax.f32 %v629_v53, 0.0  ;;  %v692_v9 = vmax.f32 %v628_v52, 0.0  ;;  %v205_v0 = vpop.permute.xlu0 %204 }
 0x114   :  { %v295_v46 = vmul.f32 %v3296_v7, %v205_v0  ;;  %v296_v47 = vmul.f32 %v3299_v8, %v205_v0 }
 0x115   :  { %v630_v58 = vadd.f32 %v3313_v17, %v554_v55  ;;  %v631_v59 = vadd.f32 %v3316_v22, %v555_v56  ;;  %v190_v60 = vpop.permute.xlu1 %189 }
 0x116   :  { %v289_v16 = vmul.f32 %v3296_v7, %v190_v60  ;;  %v290_v18 = vmul.f32 %v3299_v8, %v190_v60  ;;  %v564_v56 = vadd.f32 %v500_v44, %v295_v46 }
 0x117   :  { %v695_v4 = vmax.f32 %v631_v59, 0.0  ;;  %v694_v10 = vmax.f32 %v630_v58, 0.0  ;;  %v565_v58 = vadd.f32 %v501_v45, %v296_v47 }
 0x119   :  { %v737_v11 = vpack.c.bf16 %v695_v4, %v693_v3  ;;  %v736_v12 = vpack.c.bf16 %v694_v10, %v692_v9  ;;  %v640_v9 = vadd.f32 %v3313_v17, %v564_v56  ;;  %v641_v10 = vadd.f32 %v3316_v22, %v565_v58 }
 0x11a   :  { %v403_v15 = vpop.permute.xlu1 %402 }
 0x11b   :  { %v494_v19 = vmul.f32 %v3290_v5, %v403_v15  ;;  %v495_v20 = vmul.f32 %v3293_v6, %v403_v15  ;;  %1085 = vmatprep.mubr.bf16.mxu0 %v737_v11 }
 0x11c   :  { %1086 = vmatmul.mubr.bf16.gmra.mrb[40].mxu0 %v736_v12 }
 0x11d   :  { %v558_v21 = vadd.f32 %v494_v19, %v289_v16  ;;  %v559_v54 = vadd.f32 %v495_v20, %v290_v18  ;;  %v220_v19 = vpop.permute.xlu0 %219 }
 0x11f   :  { %v634_v57 = vadd.f32 %v3313_v17, %v558_v21  ;;  %v635_v23 = vadd.f32 %v3316_v22, %v559_v54  ;;  %v195_v24 = vpop.permute.xlu1 %194 }
 0x120   :  { %v291_v1 = vmul.f32 %v3296_v7, %v195_v24  ;;  %v292_v34 = vmul.f32 %v3299_v8, %v195_v24 }
 0x121   :  { %v699_v28 = vmax.f32 %v635_v23, 0.0  ;;  %v698_v29 = vmax.f32 %v634_v57, 0.0  ;;  %v705_v57 = vmax.f32 %v641_v10, 0.0  ;;  %v704_v23 = vmax.f32 %v640_v9, 0.0 }
 0x123   :  { %v739_v30 = vpack.c.bf16 %v699_v28, %v697_v26  ;;  %v738_v31 = vpack.c.bf16 %v698_v29, %v696_v27  ;;  %v225_v28 = vpop.permute.xlu0 %224 }
 0x124   :  { %v407_v33 = vpop.permute.xlu1 %406  ;;  %v303_v44 = vmul.f32 %v3296_v7, %v225_v28  ;;  %v304_v45 = vmul.f32 %v3299_v8, %v225_v28 }
 0x125   :  { %v496_v35 = vmul.f32 %v3290_v5, %v407_v33  ;;  %v497_v36 = vmul.f32 %v3293_v6, %v407_v33  ;;  %1095 = vmatprep.mubr.bf16.mxu0 %v739_v30 }
 0x126   :  { %1096 = vmatmul.mubr.bf16.gmra.mrb[44].mxu0 %v738_v31 }
 0x127   :  { %v560_v37 = vadd.f32 %v496_v35, %v291_v1  ;;  %v561_v38 = vadd.f32 %v497_v36, %v292_v34  ;;  %v301_v36 = vmul.f32 %v3296_v7, %v220_v19 }
 0x128   :  { %v411_v39 = vpop.permute.xlu1 %410 }
 0x129   :  { %v498_v42 = vmul.f32 %v3290_v5, %v411_v39  ;;  %v499_v43 = vmul.f32 %v3293_v6, %v411_v39  ;;  %v636_v48 = vadd.f32 %v3313_v17, %v560_v37  ;;  %v637_v49 = vadd.f32 %v3316_v22, %v561_v38 }
 0x12a   :  { %v302_v37 = vmul.f32 %v3299_v8, %v220_v19 }
 0x12b   :  { %v562_v50 = vadd.f32 %v498_v42, %v293_v40  ;;  %v563_v51 = vadd.f32 %v499_v43, %v294_v41  ;;  %v701_v59 = vmax.f32 %v637_v49, 0.0  ;;  %v700_v61 = vmax.f32 %v636_v48, 0.0  ;;  %v431_v40 = vpop.permute.xlu0 %430 }
 0x12c   :  { %v508_v46 = vmul.f32 %v3290_v5, %v431_v40  ;;  %v509_v47 = vmul.f32 %v3293_v6, %v431_v40 }
 0x12d   :  { %v638_v52 = vadd.f32 %v3313_v17, %v562_v50  ;;  %v639_v53 = vadd.f32 %v3316_v22, %v563_v51  ;;  %v210_v55 = vpop.permute.xlu1 %209 }
 0x12e   :  { %v297_v12 = vmul.f32 %v3296_v7, %v210_v55  ;;  %v298_v13 = vmul.f32 %v3299_v8, %v210_v55  ;;  %v572_v56 = vadd.f32 %v508_v46, %v303_v44  ;;  %v573_v58 = vadd.f32 %v509_v47, %v304_v45 }
 0x12f   :  { %v703_v60 = vmax.f32 %v639_v53, 0.0  ;;  %v702_v62 = vmax.f32 %v638_v52, 0.0 }
 0x130   :  { %v648_v10 = vadd.f32 %v3313_v17, %v572_v56 }
 0x131   :  { %v741_v3 = vpack.c.bf16 %v703_v60, %v701_v59  ;;  %v740_v4 = vpack.c.bf16 %v702_v62, %v700_v61 }
 0x132   :  { %v419_v11 = vpop.permute.xlu1 %418 }
 0x133   :  { %v502_v14 = vmul.f32 %v3290_v5, %v419_v11  ;;  %v503_v15 = vmul.f32 %v3293_v6, %v419_v11  ;;  %1105 = vmatprep.mubr.bf16.mxu0 %v741_v3  ;;  %v649_v11 = vadd.f32 %v3316_v22, %v573_v58 }
 0x134   :  { %1106 = vmatmul.mubr.bf16.gmra.mrb[48].mxu0 %v740_v4 }
 0x135   :  { %v566_v16 = vadd.f32 %v502_v14, %v297_v12  ;;  %v567_v18 = vadd.f32 %v503_v15, %v298_v13 }
 0x137   :  { %v642_v20 = vadd.f32 %v3313_v17, %v566_v16  ;;  %v643_v21 = vadd.f32 %v3316_v22, %v567_v18  ;;  %v215_v54 = vpop.permute.xlu1 %214  ;;  %v713_v16 = vmax.f32 %v649_v11, 0.0  ;;  %v712_v18 = vmax.f32 %v648_v10, 0.0 }
 0x138   :  { %v299_v30 = vmul.f32 %v3296_v7, %v215_v54  ;;  %v300_v31 = vmul.f32 %v3299_v8, %v215_v54 }
 0x139   :  { %v707_v24 = vmax.f32 %v643_v21, 0.0  ;;  %v706_v25 = vmax.f32 %v642_v20, 0.0 }
 0x13b   :  { %v743_v26 = vpack.c.bf16 %v707_v24, %v705_v57  ;;  %v742_v27 = vpack.c.bf16 %v706_v25, %v704_v23 }
 0x13c   :  { %v423_v29 = vpop.permute.xlu1 %422 }
 0x13d   :  { %v504_v32 = vmul.f32 %v3290_v5, %v423_v29  ;;  %v505_v33 = vmul.f32 %v3293_v6, %v423_v29  ;;  %1115 = vmatprep.mubr.bf16.mxu0 %v743_v26 }
 0x13e   :  { %1116 = vmatmul.mubr.bf16.gmra.mrb[52].mxu0 %v742_v27 }
 0x13f   :  { %v568_v1 = vadd.f32 %v504_v32, %v299_v30  ;;  %v569_v34 = vadd.f32 %v505_v33, %v300_v31 }
 0x140   :  { %v427_v35 = vpop.permute.xlu1 %426 }
 0x141   :  { %v506_v38 = vmul.f32 %v3290_v5, %v427_v35  ;;  %v507_v39 = vmul.f32 %v3293_v6, %v427_v35  ;;  %v644_v41 = vadd.f32 %v3313_v17, %v568_v1  ;;  %v645_v42 = vadd.f32 %v3316_v22, %v569_v34 }
 0x143   :  { %v570_v43 = vadd.f32 %v506_v38, %v301_v36  ;;  %v571_v0 = vadd.f32 %v507_v39, %v302_v37  ;;  %v709_v51 = vmax.f32 %v645_v42, 0.0  ;;  %v708_v53 = vmax.f32 %v644_v41, 0.0 }
 0x145   :  { %v646_v48 = vadd.f32 %v3313_v17, %v570_v43  ;;  %v647_v49 = vadd.f32 %v3316_v22, %v571_v0  ;;  %v230_v50 = vpop.permute.xlu1 %229 }
 0x146   :  { %v305_v62 = vmul.f32 %v3296_v7, %v230_v50  ;;  %v306_v3 = vmul.f32 %v3299_v8, %v230_v50 }
 0x147   :  { %v711_v52 = vmax.f32 %v647_v49, 0.0  ;;  %v710_v55 = vmax.f32 %v646_v48, 0.0 }
 0x149   :  { %v745_v59 = vpack.c.bf16 %v711_v52, %v709_v51  ;;  %v744_v60 = vpack.c.bf16 %v710_v55, %v708_v53 }
 0x14a   :  { %v435_v61 = vpop.permute.xlu1 %434 }
 0x14b   :  { %v510_v4 = vmul.f32 %v3290_v5, %v435_v61  ;;  %v511_v9 = vmul.f32 %v3293_v6, %v435_v61  ;;  %1125 = vmatprep.mubr.bf16.mxu0 %v745_v59  ;;  %v2621_v6 = vld [vmem:[%s3847_s2 + $0x1] ss:$4 sm:$0x3] }
 0x14c   :  { %1126 = vmatmul.mubr.bf16.gmra.mrb[56].mxu0 %v744_v60  ;;  %v3533_v20 = vrot.slane %v2621_v6, %v3279_v63  ;;  %v3536_v21 = vrot.slane %v2621_v6, %v3281_v2  ;;  %v2995_v6 = vld [vmem:[#allocation2 + $0x210] ss:$8 sps:$4 sm:$0xff]  }
 0x14d   :  { %v574_v12 = vadd.f32 %v510_v4, %v305_v62  ;;  %v575_v13 = vadd.f32 %v511_v9, %v306_v3  ;;  %v2992_v62 = vld [vmem:[#allocation2 + $0x200] ss:$8 sps:$4 sm:$0xff]   ;;  %v2994_v3 = vld [vmem:[#allocation2 + $0x204] ss:$8 sps:$4 sm:$0xff]  }
 0x14e   :  { %1943 = vmatprep.subr.bf16.mxu0 %v2994_v3 }
 0x14f   :  { %v650_v14 = vadd.f32 %v3313_v17, %v574_v12  ;;  %v651_v15 = vadd.f32 %v3316_v22, %v575_v13  ;;  %1944 = vmatpush1.bf16.msra.mxu0 %v2992_v62  ;;  %v3021_v62 = vld [vmem:[#allocation2 + $0x294] ss:$8 sps:$4 sm:$0xff]  }
 0x151   :  { %v715_v7 = vmax.f32 %v651_v15, 0.0  ;;  %v714_v8 = vmax.f32 %v650_v14, 0.0 }
 0x153   :  { %v747_v19 = vpack.c.bf16 %v715_v7, %v713_v16  ;;  %v746_v5 = vpack.c.bf16 %v714_v8, %v712_v18 }
 0x155   :  { %1135 = vmatprep.mubr.bf16.mxu0 %v747_v19 }
 0x156   :  { %1136 = vmatmul.mubr.bf16.gmra.mrb[60].mxu0 %v746_v5  ;;  %v2997_v5 = vld [vmem:[#allocation2 + $0x214] ss:$8 sps:$4 sm:$0xff]  }
 0x157   :  { %1945 = vmatprep.subr.bf16.mxu0 %v2997_v5  ;;  %v3022_v5 = vld [vmem:[#allocation2 + $0x2a0] ss:$8 sps:$4 sm:$0xff]  }
 0x158   :  { %1946 = vmatpush1.bf16.msra.mxu0 %v2995_v6 }
 0x177   :  { %v987_v17 = vpop.f32.mrb[0].mxu0 }
 0x178   :  { %v988_v22 = vadd.f32 %v987_v17, %v3533_v20  ;;  %v989_v54 = vpop.f32.mrb[1].mxu0 }
 0x179   :  { %v990_v57 = vadd.f32 %v989_v54, %v3536_v21  ;;  %v991_v23 = vpop.f32.mrb[2].mxu0  ;;  %v3000_v54 = vld [vmem:[#allocation2 + $0x224] ss:$8 sps:$4 sm:$0xff]  }
 0x17a   :  { %v992_v24 = vadd.f32 %v991_v23, %v3533_v20  ;;  %v993_v25 = vpop.f32.mrb[3].mxu0  ;;  %v1146_v27 = vmax.f32 %v988_v22, 0.0  ;;  %v2998_v22 = vld [vmem:[#allocation2 + $0x220] ss:$8 sps:$4 sm:$0xff]   ;;  %1947 = vmatprep.subr.bf16.mxu0 %v3000_v54 }
 0x17b   :  { %v994_v26 = vadd.f32 %v993_v25, %v3536_v21  ;;  %v1147_v29 = vmax.f32 %v990_v57, 0.0  ;;  %1948 = vmatpush1.bf16.msra.mxu0 %v2998_v22 }
 0x17c   :  { %v1148_v28 = vmax.f32 %v992_v24, 0.0 }
 0x17d   :  { %v1149_v30 = vmax.f32 %v994_v26, 0.0 }
 0x17e   :  { %v1210_v31 = vpack.c.bf16 %v1148_v28, %v1146_v27 }
 0x17f   :  { %v1211_v32 = vpack.c.bf16 %v1149_v30, %v1147_v29  ;;  %v3003_v29 = vld [vmem:[#allocation2 + $0x234] ss:$8 sps:$4 sm:$0xff]  }
 0x180   :  { %1949 = vmatprep.subr.bf16.mxu0 %v3003_v29 }
 0x181   :  { %v997_v33 = vpop.f32.mrb[4].mxu0  ;;  %1480 = vmatprep.mubr.bf16.mxu1 %v1211_v32  ;;  %v3001_v32 = vld [vmem:[#allocation2 + $0x230] ss:$8 sps:$4 sm:$0xff]  }
 0x182   :  { %v998_v1 = vadd.f32 %v997_v33, %v3533_v20  ;;  %v999_v34 = vpop.f32.mrb[5].mxu0  ;;  %1481 = vmatmul.mubr.bf16.vlgmr.msra.gmra.mrb[0].mxu1 %v1210_v31  ;;  %1950 = vmatpush1.bf16.msra.mxu0 %v3001_v32  ;;  %v3028_v32 = vld [vmem:[#allocation2 + $0x2c0] ss:$8 sps:$4 sm:$0xff]  }
 0x183   :  { %v1000_v35 = vadd.f32 %v999_v34, %v3536_v21  ;;  %v1001_v36 = vpop.f32.mrb[6].mxu0 }
 0x184   :  { %v1002_v37 = vadd.f32 %v1001_v36, %v3533_v20  ;;  %v1003_v38 = vpop.f32.mrb[7].mxu0  ;;  %v1150_v40 = vmax.f32 %v998_v1, 0.0  ;;  %v3006_v36 = vld [vmem:[#allocation2 + $0x244] ss:$8 sps:$4 sm:$0xff]  }
 0x185   :  { %v1004_v39 = vadd.f32 %v1003_v38, %v3536_v21  ;;  %v1151_v42 = vmax.f32 %v1000_v35, 0.0  ;;  %1951 = vmatprep.subr.bf16.mxu0 %v3006_v36 }
 0x186   :  { %v1152_v41 = vmax.f32 %v1002_v37, 0.0  ;;  %v3004_v37 = vld [vmem:[#allocation2 + $0x240] ss:$8 sps:$4 sm:$0xff]  }
 0x187   :  { %v1153_v43 = vmax.f32 %v1004_v39, 0.0  ;;  %1952 = vmatpush1.bf16.msra.mxu0 %v3004_v37  ;;  %v3031_v37 = vld [vmem:[#allocation2 + $0x2d0] ss:$8 sps:$4 sm:$0xff]  }
 0x188   :  { %v1212_v0 = vpack.c.bf16 %v1152_v41, %v1150_v40 }
 0x189   :  { %v1213_v44 = vpack.c.bf16 %v1153_v43, %v1151_v42  ;;  %v3009_v43 = vld [vmem:[#allocation2 + $0x254] ss:$8 sps:$4 sm:$0xff]  }
 0x18a   :  { %1953 = vmatprep.subr.bf16.mxu0 %v3009_v43 }
 0x18b   :  { %1490 = vmatprep.mubr.bf16.mxu1 %v1213_v44 }
 0x18c   :  { %1491 = vmatmul.mubr.bf16.gmra.mrb[4].mxu1 %v1212_v0 }
 0x18f   :  { %v1007_v45 = vpop.f32.mrb[8].mxu0 }
 0x190   :  { %v1008_v46 = vadd.f32 %v1007_v45, %v3533_v20  ;;  %v1009_v47 = vpop.f32.mrb[9].mxu0  ;;  %v3007_v45 = vld [vmem:[#allocation2 + $0x250] ss:$8 sps:$4 sm:$0xff]  }
 0x191   :  { %v1010_v48 = vadd.f32 %v1009_v47, %v3536_v21  ;;  %v1011_v49 = vpop.f32.mrb[10].mxu0  ;;  %v3012_v47 = vld [vmem:[#allocation2 + $0x264] ss:$8 sps:$4 sm:$0xff]   ;;  %1954 = vmatpush1.bf16.msra.mxu0 %v3007_v45 }
 0x192   :  { %v1012_v50 = vadd.f32 %v1011_v49, %v3533_v20  ;;  %v1013_v51 = vpop.f32.mrb[11].mxu0  ;;  %v1154_v53 = vmax.f32 %v1008_v46, 0.0  ;;  %1955 = vmatprep.subr.bf16.mxu0 %v3012_v47  ;;  %v3039_v47 = vld [vmem:[#allocation2 + $0x2f4] ss:$8 sps:$4 sm:$0xff]  }
 0x193   :  { %v1014_v52 = vadd.f32 %v1013_v51, %v3536_v21  ;;  %v1155_v56 = vmax.f32 %v1010_v48, 0.0 }
 0x194   :  { %v1156_v55 = vmax.f32 %v1012_v50, 0.0  ;;  %v3010_v50 = vld [vmem:[#allocation2 + $0x260] ss:$8 sps:$4 sm:$0xff]  }
 0x195   :  { %v1157_v58 = vmax.f32 %v1014_v52, 0.0  ;;  %1956 = vmatpush1.bf16.msra.mxu0 %v3010_v50  ;;  %v3037_v50 = vld [vmem:[#allocation2 + $0x2f0] ss:$8 sps:$4 sm:$0xff]  }
 0x196   :  { %v1214_v59 = vpack.c.bf16 %v1156_v55, %v1154_v53  ;;  %v3015_v53 = vld [vmem:[#allocation2 + $0x274] ss:$8 sps:$4 sm:$0xff]  }
 0x197   :  { %v1215_v60 = vpack.c.bf16 %v1157_v58, %v1155_v56  ;;  %v3013_v58 = vld [vmem:[#allocation2 + $0x270] ss:$8 sps:$4 sm:$0xff]   ;;  %1957 = vmatprep.subr.bf16.mxu0 %v3015_v53 }
 0x199   :  { %v1017_v61 = vpop.f32.mrb[12].mxu0  ;;  %1500 = vmatprep.mubr.bf16.mxu1 %v1215_v60  ;;  %1958 = vmatpush1.bf16.msra.mxu0 %v3013_v58  ;;  %v3016_v60 = vld [vmem:[#allocation2 + $0x280] ss:$8 sps:$4 sm:$0xff]  }
 0x19a   :  { %v1018_v4 = vadd.f32 %v1017_v61, %v3533_v20  ;;  %v1019_v9 = vpop.f32.mrb[13].mxu0  ;;  %1501 = vmatmul.mubr.bf16.gmra.mrb[8].mxu1 %v1214_v59  ;;  %v3018_v59 = vld [vmem:[#allocation2 + $0x284] ss:$8 sps:$4 sm:$0xff]  }
 0x19b   :  { %v1020_v10 = vadd.f32 %v1019_v9, %v3536_v21  ;;  %v1021_v11 = vpop.f32.mrb[14].mxu0  ;;  %1959 = vmatprep.subr.bf16.mxu0 %v3018_v59 }
 0x19c   :  { %v1022_v12 = vadd.f32 %v1021_v11, %v3533_v20  ;;  %v1023_v13 = vpop.f32.mrb[15].mxu0  ;;  %v1158_v15 = vmax.f32 %v1018_v4, 0.0 }
 0x19d   :  { %v1024_v14 = vadd.f32 %v1023_v13, %v3536_v21  ;;  %v1159_v7 = vmax.f32 %v1020_v10, 0.0  ;;  %1960 = vmatpush1.bf16.msra.mxu0 %v3016_v60  ;;  %v3019_v13 = vld [vmem:[#allocation2 + $0x290] ss:$8 sps:$4 sm:$0xff]  }
 0x19e   :  { %v1160_v16 = vmax.f32 %v1022_v12, 0.0  ;;  %1961 = vmatprep.subr.bf16.mxu0 %v3021_v62 }
 0x19f   :  { %v1161_v18 = vmax.f32 %v1024_v14, 0.0 }
 0x1a0   :  { %v1216_v8 = vpack.c.bf16 %v1160_v16, %v1158_v15  ;;  %v3024_v15 = vld [vmem:[#allocation2 + $0x2a4] ss:$8 sps:$4 sm:$0xff]  }
 0x1a1   :  { %v1217_v19 = vpack.c.bf16 %v1161_v18, %v1159_v7  ;;  %1962 = vmatpush1.bf16.msra.mxu0 %v3019_v13 }
 0x1a2   :  { %1963 = vmatprep.subr.bf16.mxu0 %v3024_v15 }
 0x1a3   :  { %1510 = vmatprep.mubr.bf16.mxu1 %v1217_v19 }
 0x1a4   :  { %1511 = vmatmul.mubr.bf16.gmra.mrb[12].mxu1 %v1216_v8 }
 0x1a5   :  { %1964 = vmatpush1.bf16.msra.mxu0 %v3022_v5 }
 0x1a7   :  { %v1027_v17 = vpop.f32.mrb[16].mxu0 }
 0x1a8   :  { %v1028_v57 = vadd.f32 %v1027_v17, %v3533_v20  ;;  %v1029_v23 = vpop.f32.mrb[17].mxu0  ;;  %v3027_v17 = vld [vmem:[#allocation2 + $0x2b4] ss:$8 sps:$4 sm:$0xff]  }
 0x1a9   :  { %v1030_v24 = vadd.f32 %v1029_v23, %v3536_v21  ;;  %v1031_v25 = vpop.f32.mrb[18].mxu0  ;;  %v3025_v23 = vld [vmem:[#allocation2 + $0x2b0] ss:$8 sps:$4 sm:$0xff]   ;;  %1965 = vmatprep.subr.bf16.mxu0 %v3027_v17 }
 0x1aa   :  { %v1032_v26 = vadd.f32 %v1031_v25, %v3533_v20  ;;  %v1033_v27 = vpop.f32.mrb[19].mxu0  ;;  %v1162_v30 = vmax.f32 %v1028_v57, 0.0  ;;  %1966 = vmatpush1.bf16.msra.mxu0 %v3025_v23 }
 0x1ab   :  { %v1034_v28 = vadd.f32 %v1033_v27, %v3536_v21  ;;  %v1163_v33 = vmax.f32 %v1030_v24, 0.0 }
 0x1ac   :  { %v1164_v31 = vmax.f32 %v1032_v26, 0.0  ;;  %v3030_v26 = vld [vmem:[#allocation2 + $0x2c4] ss:$8 sps:$4 sm:$0xff]  }
 0x1ad   :  { %v1165_v1 = vmax.f32 %v1034_v28, 0.0  ;;  %1967 = vmatprep.subr.bf16.mxu0 %v3030_v26 }
 0x1ae   :  { %v1218_v34 = vpack.c.bf16 %v1164_v31, %v1162_v30  ;;  %1968 = vmatpush1.bf16.msra.mxu0 %v3028_v32 }
 0x1af   :  { %v1219_v35 = vpack.c.bf16 %v1165_v1, %v1163_v33 }
 0x1b1   :  { %v1037_v38 = vpop.f32.mrb[20].mxu0  ;;  %1520 = vmatprep.mubr.bf16.mxu1 %v1219_v35 }
 0x1b2   :  { %v1038_v39 = vadd.f32 %v1037_v38, %v3533_v20  ;;  %v1039_v40 = vpop.f32.mrb[21].mxu0  ;;  %1521 = vmatmul.mubr.bf16.gmra.mrb[16].mxu1 %v1218_v34  ;;  %v3033_v34 = vld [vmem:[#allocation2 + $0x2d4] ss:$8 sps:$4 sm:$0xff]  }
 0x1b3   :  { %v1040_v41 = vadd.f32 %v1039_v40, %v3536_v21  ;;  %v1041_v42 = vpop.f32.mrb[22].mxu0  ;;  %1969 = vmatprep.subr.bf16.mxu0 %v3033_v34 }
 0x1b4   :  { %v1042_v0 = vadd.f32 %v1041_v42, %v3533_v20  ;;  %v1043_v44 = vpop.f32.mrb[23].mxu0  ;;  %v1166_v48 = vmax.f32 %v1038_v39, 0.0  ;;  %1970 = vmatpush1.bf16.msra.mxu0 %v3031_v37  ;;  %v3036_v39 = vld [vmem:[#allocation2 + $0x2e4] ss:$8 sps:$4 sm:$0xff]   ;;  %v3034_v42 = vld [vmem:[#allocation2 + $0x2e0] ss:$8 sps:$4 sm:$0xff]  }
 0x1b5   :  { %v1044_v46 = vadd.f32 %v1043_v44, %v3536_v21  ;;  %v1167_v51 = vmax.f32 %v1040_v41, 0.0  ;;  %1971 = vmatprep.subr.bf16.mxu0 %v3036_v39 }
 0x1b6   :  { %v1168_v49 = vmax.f32 %v1042_v0, 0.0 }
 0x1b7   :  { %v1169_v52 = vmax.f32 %v1044_v46, 0.0 }
 0x1b8   :  { %v1220_v55 = vpack.c.bf16 %v1168_v49, %v1166_v48  ;;  %1972 = vmatpush1.bf16.msra.mxu0 %v3034_v42 }
 0x1b9   :  { %v1221_v56 = vpack.c.bf16 %v1169_v52, %v1167_v51  ;;  %1973 = vmatprep.subr.bf16.mxu0 %v3039_v47 }
 0x1bb   :  { %1530 = vmatprep.mubr.bf16.mxu1 %v1221_v56 }
 0x1bc   :  { %1531 = vmatmul.mubr.bf16.gmra.mrb[20].mxu1 %v1220_v55  ;;  %1974 = vmatpush1.bf16.msra.mxu0 %v3037_v50 }
 0x1bf   :  { %v1047_v61 = vpop.f32.mrb[24].mxu0 }
 0x1c0   :  { %v1048_v3 = vadd.f32 %v1047_v61, %v3533_v20  ;;  %v1049_v4 = vpop.f32.mrb[25].mxu0 }
 0x1c1   :  { %v1050_v9 = vadd.f32 %v1049_v4, %v3536_v21  ;;  %v1051_v10 = vpop.f32.mrb[26].mxu0 }
 0x1c2   :  { %v1052_v11 = vadd.f32 %v1051_v10, %v3533_v20  ;;  %v1053_v12 = vpop.f32.mrb[27].mxu0  ;;  %v1170_v16 = vmax.f32 %v1048_v3, 0.0 }
 0x1c3   :  { %v1054_v14 = vadd.f32 %v1053_v12, %v3536_v21  ;;  %v1171_v18 = vmax.f32 %v1050_v9, 0.0 }
 0x1c4   :  { %v1172_v7 = vmax.f32 %v1052_v11, 0.0 }
 0x1c5   :  { %v1173_v8 = vmax.f32 %v1054_v14, 0.0 }
 0x1c6   :  { %v1222_v19 = vpack.c.bf16 %v1172_v7, %v1170_v16 }
 0x1c7   :  { %v1223_v6 = vpack.c.bf16 %v1173_v8, %v1171_v18 }
 0x1c9   :  { %v1057_v22 = vpop.f32.mrb[28].mxu0  ;;  %1540 = vmatprep.mubr.bf16.mxu1 %v1223_v6 }
 0x1ca   :  { %v1058_v54 = vadd.f32 %v1057_v22, %v3533_v20  ;;  %v1059_v57 = vpop.f32.mrb[29].mxu0  ;;  %1541 = vmatmul.mubr.bf16.gmra.mrb[24].mxu1 %v1222_v19 }
 0x1cb   :  { %v1060_v24 = vadd.f32 %v1059_v57, %v3536_v21  ;;  %v1061_v25 = vpop.f32.mrb[30].mxu0 }
 0x1cc   :  { %v1062_v27 = vadd.f32 %v1061_v25, %v3533_v20  ;;  %v1063_v28 = vpop.f32.mrb[31].mxu0  ;;  %v1174_v30 = vmax.f32 %v1058_v54, 0.0 }
 0x1cd   :  { %v1064_v29 = vadd.f32 %v1063_v28, %v3536_v21  ;;  %v1175_v33 = vmax.f32 %v1060_v24, 0.0 }
 0x1ce   :  { %v1176_v31 = vmax.f32 %v1062_v27, 0.0 }
 0x1cf   :  { %v1177_v1 = vmax.f32 %v1064_v29, 0.0 }
 0x1d0   :  { %v1224_v35 = vpack.c.bf16 %v1176_v31, %v1174_v30 }
 0x1d1   :  { %v1225_v36 = vpack.c.bf16 %v1177_v1, %v1175_v33 }
 0x1d3   :  { %1550 = vmatprep.mubr.bf16.mxu1 %v1225_v36 }
 0x1d4   :  { %1551 = vmatmul.mubr.bf16.gmra.mrb[28].mxu1 %v1224_v35 }
 0x1d7   :  { %v1067_v38 = vpop.f32.mrb[32].mxu0 }
 0x1d8   :  { %v1068_v40 = vadd.f32 %v1067_v38, %v3533_v20  ;;  %v1069_v41 = vpop.f32.mrb[33].mxu0 }
 0x1d9   :  { %v1070_v43 = vadd.f32 %v1069_v41, %v3536_v21  ;;  %v1071_v0 = vpop.f32.mrb[34].mxu0 }
 0x1da   :  { %v1072_v44 = vadd.f32 %v1071_v0, %v3533_v20  ;;  %v1073_v45 = vpop.f32.mrb[35].mxu0  ;;  %v1178_v48 = vmax.f32 %v1068_v40, 0.0 }
 0x1db   :  { %v1074_v46 = vadd.f32 %v1073_v45, %v3536_v21  ;;  %v1179_v51 = vmax.f32 %v1070_v43, 0.0 }
 0x1dc   :  { %v1180_v49 = vmax.f32 %v1072_v44, 0.0 }
 0x1dd   :  { %v1181_v52 = vmax.f32 %v1074_v46, 0.0 }
 0x1de   :  { %v1226_v53 = vpack.c.bf16 %v1180_v49, %v1178_v48 }
 0x1df   :  { %v1227_v55 = vpack.c.bf16 %v1181_v52, %v1179_v51 }
 0x1e1   :  { %v1077_v56 = vpop.f32.mrb[36].mxu0  ;;  %1560 = vmatprep.mubr.bf16.mxu1 %v1227_v55 }
 0x1e2   :  { %v1078_v58 = vadd.f32 %v1077_v56, %v3533_v20  ;;  %v1079_v59 = vpop.f32.mrb[37].mxu0  ;;  %1561 = vmatmul.mubr.bf16.gmra.mrb[32].mxu1 %v1226_v53 }
 0x1e3   :  { %v1080_v60 = vadd.f32 %v1079_v59, %v3536_v21  ;;  %v1081_v61 = vpop.f32.mrb[38].mxu0 }
 0x1e4   :  { %v1082_v62 = vadd.f32 %v1081_v61, %v3533_v20  ;;  %v1083_v3 = vpop.f32.mrb[39].mxu0  ;;  %v1182_v9 = vmax.f32 %v1078_v58, 0.0 }
 0x1e5   :  { %v1084_v4 = vadd.f32 %v1083_v3, %v3536_v21  ;;  %v1183_v11 = vmax.f32 %v1080_v60, 0.0 }
 0x1e6   :  { %v1184_v10 = vmax.f32 %v1082_v62, 0.0 }
 0x1e7   :  { %v1185_v12 = vmax.f32 %v1084_v4, 0.0 }
 0x1e8   :  { %v1228_v13 = vpack.c.bf16 %v1184_v10, %v1182_v9 }
 0x1e9   :  { %v1229_v14 = vpack.c.bf16 %v1185_v12, %v1183_v11 }
 0x1eb   :  { %1570 = vmatprep.mubr.bf16.mxu1 %v1229_v14 }
 0x1ec   :  { %1571 = vmatmul.mubr.bf16.gmra.mrb[36].mxu1 %v1228_v13 }
 0x1ef   :  { %v1087_v15 = vpop.f32.mrb[40].mxu0 }
 0x1f0   :  { %v1088_v16 = vadd.f32 %v1087_v15, %v3533_v20  ;;  %v1089_v7 = vpop.f32.mrb[41].mxu0 }
 0x1f1   :  { %v1090_v18 = vadd.f32 %v1089_v7, %v3536_v21  ;;  %v1091_v8 = vpop.f32.mrb[42].mxu0 }
 0x1f2   :  { %v1092_v19 = vadd.f32 %v1091_v8, %v3533_v20  ;;  %v1093_v5 = vpop.f32.mrb[43].mxu0  ;;  %v1186_v17 = vmax.f32 %v1088_v16, 0.0 }
 0x1f3   :  { %v1094_v6 = vadd.f32 %v1093_v5, %v3536_v21  ;;  %v1187_v54 = vmax.f32 %v1090_v18, 0.0 }
 0x1f4   :  { %v1188_v22 = vmax.f32 %v1092_v19, 0.0 }
 0x1f5   :  { %v1189_v57 = vmax.f32 %v1094_v6, 0.0 }
 0x1f6   :  { %v1230_v23 = vpack.c.bf16 %v1188_v22, %v1186_v17 }
 0x1f7   :  { %v1231_v24 = vpack.c.bf16 %v1189_v57, %v1187_v54 }
 0x1f9   :  { %v1097_v25 = vpop.f32.mrb[44].mxu0  ;;  %1580 = vmatprep.mubr.bf16.mxu1 %v1231_v24 }
 0x1fa   :  { %v1098_v26 = vadd.f32 %v1097_v25, %v3533_v20  ;;  %v1099_v27 = vpop.f32.mrb[45].mxu0  ;;  %1581 = vmatmul.mubr.bf16.gmra.mrb[40].mxu1 %v1230_v23 }
 0x1fb   :  { %v1100_v28 = vadd.f32 %v1099_v27, %v3536_v21  ;;  %v1101_v29 = vpop.f32.mrb[46].mxu0 }
 0x1fc   :  { %v1102_v30 = vadd.f32 %v1101_v29, %v3533_v20  ;;  %v1103_v31 = vpop.f32.mrb[47].mxu0  ;;  %v1190_v33 = vmax.f32 %v1098_v26, 0.0 }
 0x1fd   :  { %v1104_v32 = vadd.f32 %v1103_v31, %v3536_v21  ;;  %v1191_v34 = vmax.f32 %v1100_v28, 0.0 }
 0x1fe   :  { %v1192_v1 = vmax.f32 %v1102_v30, 0.0 }
 0x1ff   :  { %v1193_v35 = vmax.f32 %v1104_v32, 0.0 }
 0x200   :  { %v1232_v36 = vpack.c.bf16 %v1192_v1, %v1190_v33 }
 0x201   :  { %v1233_v37 = vpack.c.bf16 %v1193_v35, %v1191_v34  ;;  %v2654_v34 = vld [vmem:[%s3847_s2 + $0x2] ss:$4 sm:$0x3] }
 0x202   :  { %v3606_v35 = vrot.slane %v2654_v34, %v3279_v63 }
 0x203   :  { %1590 = vmatprep.mubr.bf16.mxu1 %v1233_v37 }
 0x204   :  { %1591 = vmatmul.mubr.bf16.gmra.mrb[44].mxu1 %v1232_v36 }
 0x207   :  { %v1107_v38 = vpop.f32.mrb[48].mxu0 }
 0x208   :  { %v1108_v39 = vadd.f32 %v1107_v38, %v3533_v20  ;;  %v1109_v40 = vpop.f32.mrb[49].mxu0 }
 0x209   :  { %v1110_v41 = vadd.f32 %v1109_v40, %v3536_v21  ;;  %v1111_v42 = vpop.f32.mrb[50].mxu0 }
 0x20a   :  { %v1112_v43 = vadd.f32 %v1111_v42, %v3533_v20  ;;  %v1113_v0 = vpop.f32.mrb[51].mxu0  ;;  %v1194_v45 = vmax.f32 %v1108_v39, 0.0 }
 0x20b   :  { %v1114_v44 = vadd.f32 %v1113_v0, %v3536_v21  ;;  %v1195_v47 = vmax.f32 %v1110_v41, 0.0 }
 0x20c   :  { %v1196_v46 = vmax.f32 %v1112_v43, 0.0 }
 0x20d   :  { %v1197_v48 = vmax.f32 %v1114_v44, 0.0 }
 0x20e   :  { %v1234_v49 = vpack.c.bf16 %v1196_v46, %v1194_v45 }
 0x20f   :  { %v1235_v50 = vpack.c.bf16 %v1197_v48, %v1195_v47 }
 0x211   :  { %v1117_v51 = vpop.f32.mrb[52].mxu0  ;;  %1600 = vmatprep.mubr.bf16.mxu1 %v1235_v50 }
 0x212   :  { %v1118_v52 = vadd.f32 %v1117_v51, %v3533_v20  ;;  %v1119_v53 = vpop.f32.mrb[53].mxu0  ;;  %1601 = vmatmul.mubr.bf16.gmra.mrb[48].mxu1 %v1234_v49 }
 0x213   :  { %v1120_v55 = vadd.f32 %v1119_v53, %v3536_v21  ;;  %v1121_v56 = vpop.f32.mrb[54].mxu0 }
 0x214   :  { %v1122_v58 = vadd.f32 %v1121_v56, %v3533_v20  ;;  %v1123_v59 = vpop.f32.mrb[55].mxu0  ;;  %v1198_v61 = vmax.f32 %v1118_v52, 0.0 }
 0x215   :  { %v1124_v60 = vadd.f32 %v1123_v59, %v3536_v21  ;;  %v1199_v3 = vmax.f32 %v1120_v55, 0.0 }
 0x216   :  { %v1200_v62 = vmax.f32 %v1122_v58, 0.0 }
 0x217   :  { %v1201_v4 = vmax.f32 %v1124_v60, 0.0 }
 0x218   :  { %v1236_v9 = vpack.c.bf16 %v1200_v62, %v1198_v61 }
 0x219   :  { %v1237_v10 = vpack.c.bf16 %v1201_v4, %v1199_v3 }
 0x21b   :  { %1610 = vmatprep.mubr.bf16.mxu1 %v1237_v10 }
 0x21c   :  { %1611 = vmatmul.mubr.bf16.gmra.mrb[52].mxu1 %v1236_v9 }
 0x21f   :  { %v1127_v11 = vpop.f32.mrb[56].mxu0 }
 0x220   :  { %v1128_v12 = vadd.f32 %v1127_v11, %v3533_v20  ;;  %v1129_v13 = vpop.f32.mrb[57].mxu0 }
 0x221   :  { %v1130_v14 = vadd.f32 %v1129_v13, %v3536_v21  ;;  %v1131_v15 = vpop.f32.mrb[58].mxu0 }
 0x222   :  { %v1132_v16 = vadd.f32 %v1131_v15, %v3533_v20  ;;  %v1133_v7 = vpop.f32.mrb[59].mxu0  ;;  %v1202_v8 = vmax.f32 %v1128_v12, 0.0 }
 0x223   :  { %v1134_v18 = vadd.f32 %v1133_v7, %v3536_v21  ;;  %v1203_v5 = vmax.f32 %v1130_v14, 0.0 }
 0x224   :  { %v1204_v19 = vmax.f32 %v1132_v16, 0.0 }
 0x225   :  { %v1205_v6 = vmax.f32 %v1134_v18, 0.0 }
 0x226   :  { %v1238_v17 = vpack.c.bf16 %v1204_v19, %v1202_v8 }
 0x227   :  { %v1239_v22 = vpack.c.bf16 %v1205_v6, %v1203_v5 }
 0x229   :  { %v1137_v54 = vpop.f32.mrb[60].mxu0  ;;  %1620 = vmatprep.mubr.bf16.mxu1 %v1239_v22  ;;  %v3041_v22 = vld [vmem:[%s3849_s4] sm:$0xff]  }
 0x22a   :  { %v1138_v57 = vadd.f32 %v1137_v54, %v3533_v20  ;;  %v1139_v23 = vpop.f32.mrb[61].mxu0  ;;  %1621 = vmatmul.mubr.bf16.gmra.mrb[56].mxu1 %v1238_v17  ;;  %v3040_v17 = vld [vmem:[%s3849_s4 + $0x40] sm:$0xff]  }
 0x22b   :  { %v1140_v24 = vadd.f32 %v1139_v23, %v3536_v21  ;;  %v1141_v25 = vpop.f32.mrb[62].mxu0  ;;  %2737 = vmatprep.subr.bf16.mxu1 %v3040_v17 }
 0x22c   :  { %v1142_v26 = vadd.f32 %v1141_v25, %v3533_v20  ;;  %v1143_v27 = vpop.f32.mrb[63].mxu0  ;;  %v1206_v29 = vmax.f32 %v1138_v57, 0.0  ;;  %v3609_v20 = vrot.slane %v2654_v34, %v3281_v2  ;;  %2738 = vmatpush3.bf16.msra.mxu1 %v3041_v22 }
 0x22d   :  { %v1144_v28 = vadd.f32 %v1143_v27, %v3536_v21  ;;  %v1207_v31 = vmax.f32 %v1140_v24, 0.0 }
 0x22e   :  { %v1208_v30 = vmax.f32 %v1142_v26, 0.0 }
 0x22f   :  { %v1209_v32 = vmax.f32 %v1144_v28, 0.0 }
 0x230   :  { %v1240_v33 = vpack.c.bf16 %v1208_v30, %v1206_v29 }
 0x231   :  { %v1241_v1 = vpack.c.bf16 %v1209_v32, %v1207_v31 }
 0x233   :  { %1630 = vmatprep.mubr.bf16.mxu1 %v1241_v1 }
 0x234   :  { %1631 = vmatmul.mubr.bf16.gmra.mrb[60].mxu1 %v1240_v33 }
 0x255   :  { %v1482_v36 = vpop.f32.mrb[0].mxu1 }
 0x256   :  { %v1483_v21 = vadd.f32 %v1482_v36, %v3606_v35  ;;  %v1484_v37 = vpop.f32.mrb[1].mxu1 }
 0x257   :  { %v1485_v38 = vadd.f32 %v1484_v37, %v3609_v20  ;;  %v1486_v39 = vpop.f32.mrb[2].mxu1 }
 0x258   :  { %v1487_v40 = vadd.f32 %v1486_v39, %v3606_v35  ;;  %v1488_v41 = vpop.f32.mrb[3].mxu1  ;;  %v1641_v43 = vmax.f32 %v1483_v21, 0.0 }
 0x259   :  { %v1489_v42 = vadd.f32 %v1488_v41, %v3609_v20  ;;  %v1642_v44 = vmax.f32 %v1485_v38, 0.0 }
 0x25a   :  { %v1643_v0 = vmax.f32 %v1487_v40, 0.0 }
 0x25b   :  { %v1644_v45 = vmax.f32 %v1489_v42, 0.0 }
 0x25c   :  { %v1705_v46 = vpack.c.bf16 %v1643_v0, %v1641_v43  ;;  %v3042_v43 = vld [vmem:[%s3849_s4 + $0x48] sm:$0xff]  }
 0x25d   :  { %v1706_v47 = vpack.c.bf16 %v1644_v45, %v1642_v44  ;;  %v3043_v45 = vld [vmem:[%s3849_s4 + $0x8] sm:$0xff]   ;;  %2739 = vmatprep.subr.bf16.mxu1 %v3042_v43  ;;  %v3053_v43 = vld [vmem:[%s3849_s4 + $0x30] sm:$0xff]  }
 0x25e   :  { %2740 = vmatpush3.bf16.msra.mxu1 %v3043_v45 }
 0x25f   :  { %v1492_v48 = vpop.f32.mrb[4].mxu1  ;;  %1975 = vmatprep.mubr.bf16.mxu0 %v1706_v47 }
 0x260   :  { %v1493_v49 = vadd.f32 %v1492_v48, %v3606_v35  ;;  %v1494_v50 = vpop.f32.mrb[5].mxu1  ;;  %1976 = vmatmul.mubr.bf16.vlgmr.msra.gmra.mrb[64].mxu0 %v1705_v46 }
 0x261   :  { %v1495_v51 = vadd.f32 %v1494_v50, %v3609_v20  ;;  %v1496_v52 = vpop.f32.mrb[6].mxu1 }
 0x262   :  { %v1497_v53 = vadd.f32 %v1496_v52, %v3606_v35  ;;  %v1498_v55 = vpop.f32.mrb[7].mxu1  ;;  %v1645_v58 = vmax.f32 %v1493_v49, 0.0 }
 0x263   :  { %v1499_v56 = vadd.f32 %v1498_v55, %v3609_v20  ;;  %v1646_v60 = vmax.f32 %v1495_v51, 0.0 }
 0x264   :  { %v1647_v59 = vmax.f32 %v1497_v53, 0.0 }
 0x265   :  { %v1648_v61 = vmax.f32 %v1499_v56, 0.0  ;;  %v3044_v56 = vld [vmem:[%s3849_s4 + $0x50] sm:$0xff]  }
 0x266   :  { %v1707_v62 = vpack.c.bf16 %v1647_v59, %v1645_v58  ;;  %v3045_v58 = vld [vmem:[%s3849_s4 + $0x10] sm:$0xff]   ;;  %v3046_v59 = vld [vmem:[%s3849_s4 + $0x58] sm:$0xff]   ;;  %2741 = vmatprep.subr.bf16.mxu1 %v3044_v56 }
 0x267   :  { %v1708_v3 = vpack.c.bf16 %v1648_v61, %v1646_v60  ;;  %2742 = vmatpush3.bf16.msra.mxu1 %v3045_v58 }
 0x268   :  { %2743 = vmatprep.subr.bf16.mxu1 %v3046_v59 }
 0x269   :  { %1985 = vmatprep.mubr.bf16.mxu0 %v1708_v3 }
 0x26a   :  { %1986 = vmatmul.mubr.bf16.gmra.mrb[68].mxu0 %v1707_v62 }
 0x26d   :  { %v1502_v4 = vpop.f32.mrb[8].mxu1 }
 0x26e   :  { %v1503_v9 = vadd.f32 %v1502_v4, %v3606_v35  ;;  %v1504_v10 = vpop.f32.mrb[9].mxu1 }
 0x26f   :  { %v1505_v11 = vadd.f32 %v1504_v10, %v3609_v20  ;;  %v1506_v12 = vpop.f32.mrb[10].mxu1 }
 0x270   :  { %v1507_v13 = vadd.f32 %v1506_v12, %v3606_v35  ;;  %v1508_v14 = vpop.f32.mrb[11].mxu1  ;;  %v1649_v16 = vmax.f32 %v1503_v9, 0.0  ;;  %v3047_v9 = vld [vmem:[%s3849_s4 + $0x18] sm:$0xff]  }
 0x271   :  { %v1509_v15 = vadd.f32 %v1508_v14, %v3609_v20  ;;  %v1650_v18 = vmax.f32 %v1505_v11, 0.0  ;;  %v3048_v11 = vld [vmem:[%s3849_s4 + $0x60] sm:$0xff]   ;;  %2744 = vmatpush3.bf16.msra.mxu1 %v3047_v9  ;;  %v3050_v14 = vld [vmem:[%s3849_s4 + $0x68] sm:$0xff]  }
 0x272   :  { %v1651_v7 = vmax.f32 %v1507_v13, 0.0  ;;  %v3049_v13 = vld [vmem:[%s3849_s4 + $0x20] sm:$0xff]   ;;  %2745 = vmatprep.subr.bf16.mxu1 %v3048_v11 }
 0x273   :  { %v1652_v8 = vmax.f32 %v1509_v15, 0.0 }
 0x274   :  { %v1709_v19 = vpack.c.bf16 %v1651_v7, %v1649_v16 }
 0x275   :  { %v1710_v5 = vpack.c.bf16 %v1652_v8, %v1650_v18  ;;  %2746 = vmatpush3.bf16.msra.mxu1 %v3049_v13 }
 0x276   :  { %2747 = vmatprep.subr.bf16.mxu1 %v3050_v14 }
 0x277   :  { %v1512_v6 = vpop.f32.mrb[12].mxu1  ;;  %1995 = vmatprep.mubr.bf16.mxu0 %v1710_v5 }
 0x278   :  { %v1513_v54 = vadd.f32 %v1512_v6, %v3606_v35  ;;  %v1514_v57 = vpop.f32.mrb[13].mxu1  ;;  %1996 = vmatmul.mubr.bf16.gmra.mrb[72].mxu0 %v1709_v19 }
 0x279   :  { %v1515_v23 = vadd.f32 %v1514_v57, %v3609_v20  ;;  %v1516_v24 = vpop.f32.mrb[14].mxu1 }
 0x27a   :  { %v1517_v25 = vadd.f32 %v1516_v24, %v3606_v35  ;;  %v1518_v26 = vpop.f32.mrb[15].mxu1  ;;  %v1653_v28 = vmax.f32 %v1513_v54, 0.0 }
 0x27b   :  { %v1519_v27 = vadd.f32 %v1518_v26, %v3609_v20  ;;  %v1654_v30 = vmax.f32 %v1515_v23, 0.0 }
 0x27c   :  { %v1655_v29 = vmax.f32 %v1517_v25, 0.0 }
 0x27d   :  { %v1656_v31 = vmax.f32 %v1519_v27, 0.0 }
 0x27e   :  { %v1711_v32 = vpack.c.bf16 %v1655_v29, %v1653_v28 }
 0x27f   :  { %v1712_v33 = vpack.c.bf16 %v1656_v31, %v1654_v30 }
 0x281   :  { %2005 = vmatprep.mubr.bf16.mxu0 %v1712_v33 }
 0x282   :  { %2006 = vmatmul.mubr.bf16.gmra.mrb[76].mxu0 %v1711_v32 }
 0x285   :  { %v1522_v1 = vpop.f32.mrb[16].mxu1 }
 0x286   :  { %v1523_v34 = vadd.f32 %v1522_v1, %v3606_v35  ;;  %v1524_v36 = vpop.f32.mrb[17].mxu1 }
 0x287   :  { %v1525_v21 = vadd.f32 %v1524_v36, %v3609_v20  ;;  %v1526_v37 = vpop.f32.mrb[18].mxu1 }
 0x288   :  { %v1527_v38 = vadd.f32 %v1526_v37, %v3606_v35  ;;  %v1528_v39 = vpop.f32.mrb[19].mxu1  ;;  %v1657_v41 = vmax.f32 %v1523_v34, 0.0 }
 0x289   :  { %v1529_v40 = vadd.f32 %v1528_v39, %v3609_v20  ;;  %v1658_v0 = vmax.f32 %v1525_v21, 0.0 }
 0x28a   :  { %v1659_v42 = vmax.f32 %v1527_v38, 0.0  ;;  %v3051_v38 = vld [vmem:[%s3849_s4 + $0x28] sm:$0xff]  }
 0x28b   :  { %v1660_v44 = vmax.f32 %v1529_v40, 0.0  ;;  %2748 = vmatpush3.bf16.msra.mxu1 %v3051_v38  ;;  %v3052_v40 = vld [vmem:[%s3849_s4 + $0x70] sm:$0xff]  }
 0x28c   :  { %v1713_v46 = vpack.c.bf16 %v1659_v42, %v1657_v41  ;;  %2749 = vmatprep.subr.bf16.mxu1 %v3052_v40 }
 0x28d   :  { %v1714_v47 = vpack.c.bf16 %v1660_v44, %v1658_v0 }
 0x28f   :  { %v1532_v48 = vpop.f32.mrb[20].mxu1  ;;  %2015 = vmatprep.mubr.bf16.mxu0 %v1714_v47  ;;  %2750 = vmatpush3.bf16.msra.mxu1 %v3053_v43 }
 0x290   :  { %v1533_v49 = vadd.f32 %v1532_v48, %v3606_v35  ;;  %v1534_v50 = vpop.f32.mrb[21].mxu1  ;;  %2016 = vmatmul.mubr.bf16.gmra.mrb[80].mxu0 %v1713_v46  ;;  %v3054_v48 = vld [vmem:[%s3849_s4 + $0x78] sm:$0xff]  }
 0x291   :  { %v1535_v51 = vadd.f32 %v1534_v50, %v3609_v20  ;;  %v1536_v52 = vpop.f32.mrb[22].mxu1  ;;  %2751 = vmatprep.subr.bf16.mxu1 %v3054_v48 }
 0x292   :  { %v1537_v53 = vadd.f32 %v1536_v52, %v3606_v35  ;;  %v1538_v55 = vpop.f32.mrb[23].mxu1  ;;  %v1661_v61 = vmax.f32 %v1533_v49, 0.0 }
 0x293   :  { %v1539_v60 = vadd.f32 %v1538_v55, %v3609_v20  ;;  %v1662_v3 = vmax.f32 %v1535_v51, 0.0  ;;  %v3055_v51 = vld [vmem:[%s3849_s4 + $0x38] sm:$0xff]  }
 0x294   :  { %v1663_v62 = vmax.f32 %v1537_v53, 0.0  ;;  %2752 = vmatpush3.bf16.msra.mxu1 %v3055_v51 }
 0x295   :  { %v1664_v4 = vmax.f32 %v1539_v60, 0.0 }
 0x296   :  { %v1715_v10 = vpack.c.bf16 %v1663_v62, %v1661_v61 }
 0x297   :  { %v1716_v12 = vpack.c.bf16 %v1664_v4, %v1662_v3 }
 0x299   :  { %2025 = vmatprep.mubr.bf16.mxu0 %v1716_v12 }
 0x29a   :  { %2026 = vmatmul.mubr.bf16.gmra.mrb[84].mxu0 %v1715_v10 }
 0x29d   :  { %v1542_v15 = vpop.f32.mrb[24].mxu1 }
 0x29e   :  { %v1543_v16 = vadd.f32 %v1542_v15, %v3606_v35  ;;  %v1544_v7 = vpop.f32.mrb[25].mxu1 }
 0x29f   :  { %v1545_v18 = vadd.f32 %v1544_v7, %v3609_v20  ;;  %v1546_v8 = vpop.f32.mrb[26].mxu1 }
 0x2a0   :  { %v1547_v19 = vadd.f32 %v1546_v8, %v3606_v35  ;;  %v1548_v5 = vpop.f32.mrb[27].mxu1  ;;  %v1665_v17 = vmax.f32 %v1543_v16, 0.0 }
 0x2a1   :  { %v1549_v6 = vadd.f32 %v1548_v5, %v3609_v20  ;;  %v1666_v54 = vmax.f32 %v1545_v18, 0.0 }
 0x2a2   :  { %v1667_v22 = vmax.f32 %v1547_v19, 0.0 }
 0x2a3   :  { %v1668_v57 = vmax.f32 %v1549_v6, 0.0 }
 0x2a4   :  { %v1717_v23 = vpack.c.bf16 %v1667_v22, %v1665_v17 }
 0x2a5   :  { %v1718_v24 = vpack.c.bf16 %v1668_v57, %v1666_v54 }
 0x2a7   :  { %v1552_v25 = vpop.f32.mrb[28].mxu1  ;;  %2035 = vmatprep.mubr.bf16.mxu0 %v1718_v24 }
 0x2a8   :  { %v1553_v26 = vadd.f32 %v1552_v25, %v3606_v35  ;;  %v1554_v27 = vpop.f32.mrb[29].mxu1  ;;  %2036 = vmatmul.mubr.bf16.gmra.mrb[88].mxu0 %v1717_v23 }
 0x2a9   :  { %v1555_v28 = vadd.f32 %v1554_v27, %v3609_v20  ;;  %v1556_v29 = vpop.f32.mrb[30].mxu1 }
 0x2aa   :  { %v1557_v30 = vadd.f32 %v1556_v29, %v3606_v35  ;;  %v1558_v31 = vpop.f32.mrb[31].mxu1  ;;  %v1669_v33 = vmax.f32 %v1553_v26, 0.0 }
 0x2ab   :  { %v1559_v32 = vadd.f32 %v1558_v31, %v3609_v20  ;;  %v1670_v34 = vmax.f32 %v1555_v28, 0.0 }
 0x2ac   :  { %v1671_v1 = vmax.f32 %v1557_v30, 0.0 }
 0x2ad   :  { %v1672_v36 = vmax.f32 %v1559_v32, 0.0 }
 0x2ae   :  { %v1719_v21 = vpack.c.bf16 %v1671_v1, %v1669_v33 }
 0x2af   :  { %v1720_v37 = vpack.c.bf16 %v1672_v36, %v1670_v34 }
 0x2b1   :  { %2045 = vmatprep.mubr.bf16.mxu0 %v1720_v37 }
 0x2b2   :  { %2046 = vmatmul.mubr.bf16.gmra.mrb[92].mxu0 %v1719_v21 }
 0x2b5   :  { %v1562_v39 = vpop.f32.mrb[32].mxu1 }
 0x2b6   :  { %v1563_v41 = vadd.f32 %v1562_v39, %v3606_v35  ;;  %v1564_v42 = vpop.f32.mrb[33].mxu1 }
 0x2b7   :  { %v1565_v0 = vadd.f32 %v1564_v42, %v3609_v20  ;;  %v1566_v44 = vpop.f32.mrb[34].mxu1 }
 0x2b8   :  { %v1567_v45 = vadd.f32 %v1566_v44, %v3606_v35  ;;  %v1568_v46 = vpop.f32.mrb[35].mxu1  ;;  %v1673_v49 = vmax.f32 %v1563_v41, 0.0 }
 0x2b9   :  { %v1569_v47 = vadd.f32 %v1568_v46, %v3609_v20  ;;  %v1674_v52 = vmax.f32 %v1565_v0, 0.0 }
 0x2ba   :  { %v1675_v50 = vmax.f32 %v1567_v45, 0.0 }
 0x2bb   :  { %v1676_v53 = vmax.f32 %v1569_v47, 0.0 }
 0x2bc   :  { %v1721_v55 = vpack.c.bf16 %v1675_v50, %v1673_v49 }
 0x2bd   :  { %v1722_v56 = vpack.c.bf16 %v1676_v53, %v1674_v52 }
 0x2bf   :  { %v1572_v58 = vpop.f32.mrb[36].mxu1  ;;  %2055 = vmatprep.mubr.bf16.mxu0 %v1722_v56 }
 0x2c0   :  { %v1573_v59 = vadd.f32 %v1572_v58, %v3606_v35  ;;  %v1574_v60 = vpop.f32.mrb[37].mxu1  ;;  %2056 = vmatmul.mubr.bf16.gmra.mrb[96].mxu0 %v1721_v55 }
 0x2c1   :  { %v1575_v61 = vadd.f32 %v1574_v60, %v3609_v20  ;;  %v1576_v62 = vpop.f32.mrb[38].mxu1 }
 0x2c2   :  { %v1577_v3 = vadd.f32 %v1576_v62, %v3606_v35  ;;  %v1578_v4 = vpop.f32.mrb[39].mxu1  ;;  %v1677_v10 = vmax.f32 %v1573_v59, 0.0 }
 0x2c3   :  { %v1579_v9 = vadd.f32 %v1578_v4, %v3609_v20  ;;  %v1678_v12 = vmax.f32 %v1575_v61, 0.0 }
 0x2c4   :  { %v1679_v11 = vmax.f32 %v1577_v3, 0.0 }
 0x2c5   :  { %v1680_v13 = vmax.f32 %v1579_v9, 0.0 }
 0x2c6   :  { %v1723_v14 = vpack.c.bf16 %v1679_v11, %v1677_v10 }
 0x2c7   :  { %v1724_v15 = vpack.c.bf16 %v1680_v13, %v1678_v12 }
 0x2c9   :  { %2065 = vmatprep.mubr.bf16.mxu0 %v1724_v15 }
 0x2ca   :  { %2066 = vmatmul.mubr.bf16.gmra.mrb[100].mxu0 %v1723_v14 }
 0x2cd   :  { %v1582_v16 = vpop.f32.mrb[40].mxu1 }
 0x2ce   :  { %v1583_v7 = vadd.f32 %v1582_v16, %v3606_v35  ;;  %v1584_v18 = vpop.f32.mrb[41].mxu1 }
 0x2cf   :  { %v1585_v8 = vadd.f32 %v1584_v18, %v3609_v20  ;;  %v1586_v19 = vpop.f32.mrb[42].mxu1 }
 0x2d0   :  { %v1587_v5 = vadd.f32 %v1586_v19, %v3606_v35  ;;  %v1588_v6 = vpop.f32.mrb[43].mxu1  ;;  %v1681_v22 = vmax.f32 %v1583_v7, 0.0 }
 0x2d1   :  { %v1589_v17 = vadd.f32 %v1588_v6, %v3609_v20  ;;  %v1682_v57 = vmax.f32 %v1585_v8, 0.0 }
 0x2d2   :  { %v1683_v54 = vmax.f32 %v1587_v5, 0.0 }
 0x2d3   :  { %v1684_v23 = vmax.f32 %v1589_v17, 0.0 }
 0x2d4   :  { %v1725_v24 = vpack.c.bf16 %v1683_v54, %v1681_v22 }
 0x2d5   :  { %v1726_v25 = vpack.c.bf16 %v1684_v23, %v1682_v57 }
 0x2d7   :  { %v1592_v26 = vpop.f32.mrb[44].mxu1  ;;  %2075 = vmatprep.mubr.bf16.mxu0 %v1726_v25 }
 0x2d8   :  { %v1593_v27 = vadd.f32 %v1592_v26, %v3606_v35  ;;  %v1594_v28 = vpop.f32.mrb[45].mxu1  ;;  %2076 = vmatmul.mubr.bf16.gmra.mrb[104].mxu0 %v1725_v24 }
 0x2d9   :  { %v1595_v29 = vadd.f32 %v1594_v28, %v3609_v20  ;;  %v1596_v30 = vpop.f32.mrb[46].mxu1 }
 0x2da   :  { %v1597_v31 = vadd.f32 %v1596_v30, %v3606_v35  ;;  %v1598_v32 = vpop.f32.mrb[47].mxu1  ;;  %v1685_v1 = vmax.f32 %v1593_v27, 0.0 }
 0x2db   :  { %v1599_v33 = vadd.f32 %v1598_v32, %v3609_v20  ;;  %v1686_v36 = vmax.f32 %v1595_v29, 0.0 }
 0x2dc   :  { %v1687_v34 = vmax.f32 %v1597_v31, 0.0 }
 0x2dd   :  { %v1688_v21 = vmax.f32 %v1599_v33, 0.0 }
 0x2de   :  { %v1727_v37 = vpack.c.bf16 %v1687_v34, %v1685_v1 }
 0x2df   :  { %v1728_v38 = vpack.c.bf16 %v1688_v21, %v1686_v36  ;;  %v2687_v36 = vld [vmem:[%s3847_s2 + $0x3] ss:$4 sm:$0x3] }
 0x2e0   :  { %v3727_v21 = vrot.slane %v2687_v36, %v3279_v63 }
 0x2e1   :  { %2085 = vmatprep.mubr.bf16.mxu0 %v1728_v38 }
 0x2e2   :  { %2086 = vmatmul.mubr.bf16.gmra.mrb[108].mxu0 %v1727_v37 }
 0x2e5   :  { %v1602_v39 = vpop.f32.mrb[48].mxu1 }
 0x2e6   :  { %v1603_v40 = vadd.f32 %v1602_v39, %v3606_v35  ;;  %v1604_v41 = vpop.f32.mrb[49].mxu1 }
 0x2e7   :  { %v1605_v42 = vadd.f32 %v1604_v41, %v3609_v20  ;;  %v1606_v43 = vpop.f32.mrb[50].mxu1 }
 0x2e8   :  { %v1607_v0 = vadd.f32 %v1606_v43, %v3606_v35  ;;  %v1608_v44 = vpop.f32.mrb[51].mxu1  ;;  %v1689_v46 = vmax.f32 %v1603_v40, 0.0 }
 0x2e9   :  { %v1609_v45 = vadd.f32 %v1608_v44, %v3609_v20  ;;  %v1690_v48 = vmax.f32 %v1605_v42, 0.0 }
 0x2ea   :  { %v1691_v47 = vmax.f32 %v1607_v0, 0.0 }
 0x2eb   :  { %v1692_v49 = vmax.f32 %v1609_v45, 0.0 }
 0x2ec   :  { %v1729_v50 = vpack.c.bf16 %v1691_v47, %v1689_v46 }
 0x2ed   :  { %v1730_v51 = vpack.c.bf16 %v1692_v49, %v1690_v48 }
 0x2ef   :  { %v1612_v52 = vpop.f32.mrb[52].mxu1  ;;  %2095 = vmatprep.mubr.bf16.mxu0 %v1730_v51 }
 0x2f0   :  { %v1613_v53 = vadd.f32 %v1612_v52, %v3606_v35  ;;  %v1614_v55 = vpop.f32.mrb[53].mxu1  ;;  %2096 = vmatmul.mubr.bf16.gmra.mrb[112].mxu0 %v1729_v50 }
 0x2f1   :  { %v1615_v56 = vadd.f32 %v1614_v55, %v3609_v20  ;;  %v1616_v58 = vpop.f32.mrb[54].mxu1 }
 0x2f2   :  { %v1617_v59 = vadd.f32 %v1616_v58, %v3606_v35  ;;  %v1618_v60 = vpop.f32.mrb[55].mxu1  ;;  %v1693_v62 = vmax.f32 %v1613_v53, 0.0 }
 0x2f3   :  { %v1619_v61 = vadd.f32 %v1618_v60, %v3609_v20  ;;  %v1694_v4 = vmax.f32 %v1615_v56, 0.0 }
 0x2f4   :  { %v1695_v3 = vmax.f32 %v1617_v59, 0.0 }
 0x2f5   :  { %v1696_v9 = vmax.f32 %v1619_v61, 0.0 }
 0x2f6   :  { %v1731_v10 = vpack.c.bf16 %v1695_v3, %v1693_v62 }
 0x2f7   :  { %v1732_v11 = vpack.c.bf16 %v1696_v9, %v1694_v4 }
 0x2f9   :  { %2105 = vmatprep.mubr.bf16.mxu0 %v1732_v11 }
 0x2fa   :  { %2106 = vmatmul.mubr.bf16.gmra.mrb[116].mxu0 %v1731_v10 }
 0x2fd   :  { %v1622_v12 = vpop.f32.mrb[56].mxu1 }
 0x2fe   :  { %v1623_v13 = vadd.f32 %v1622_v12, %v3606_v35  ;;  %v1624_v14 = vpop.f32.mrb[57].mxu1 }
 0x2ff   :  { %v1625_v15 = vadd.f32 %v1624_v14, %v3609_v20  ;;  %v1626_v16 = vpop.f32.mrb[58].mxu1 }
 0x300   :  { %v1627_v7 = vadd.f32 %v1626_v16, %v3606_v35  ;;  %v1628_v18 = vpop.f32.mrb[59].mxu1  ;;  %v1697_v19 = vmax.f32 %v1623_v13, 0.0 }
 0x301   :  { %v1629_v8 = vadd.f32 %v1628_v18, %v3609_v20  ;;  %v1698_v6 = vmax.f32 %v1625_v15, 0.0 }
 0x302   :  { %v1699_v5 = vmax.f32 %v1627_v7, 0.0 }
 0x303   :  { %v1700_v17 = vmax.f32 %v1629_v8, 0.0 }
 0x304   :  { %v1733_v22 = vpack.c.bf16 %v1699_v5, %v1697_v19 }
 0x305   :  { %v1734_v54 = vpack.c.bf16 %v1700_v17, %v1698_v6 }
 0x307   :  { %v1632_v57 = vpop.f32.mrb[60].mxu1  ;;  %2115 = vmatprep.mubr.bf16.mxu0 %v1734_v54 }
 0x308   :  { %v1633_v23 = vadd.f32 %v1632_v57, %v3606_v35  ;;  %v1634_v24 = vpop.f32.mrb[61].mxu1  ;;  %2116 = vmatmul.mubr.bf16.gmra.mrb[120].mxu0 %v1733_v22 }
 0x309   :  { %v1635_v25 = vadd.f32 %v1634_v24, %v3609_v20  ;;  %v1636_v26 = vpop.f32.mrb[62].mxu1 }
 0x30a   :  { %v1637_v27 = vadd.f32 %v1636_v26, %v3606_v35  ;;  %v1638_v28 = vpop.f32.mrb[63].mxu1  ;;  %v1701_v30 = vmax.f32 %v1633_v23, 0.0  ;;  %v3730_v35 = vrot.slane %v2687_v36, %v3281_v2 }
 0x30b   :  { %v1639_v29 = vadd.f32 %v1638_v28, %v3609_v20  ;;  %v1702_v32 = vmax.f32 %v1635_v25, 0.0 }
 0x30c   :  { %v1703_v31 = vmax.f32 %v1637_v27, 0.0 }
 0x30d   :  { %v1704_v33 = vmax.f32 %v1639_v29, 0.0 }
 0x30e   :  { %v1735_v1 = vpack.c.bf16 %v1703_v31, %v1701_v30 }
 0x30f   :  { %v1736_v34 = vpack.c.bf16 %v1704_v33, %v1702_v32 }
 0x311   :  { %2125 = vmatprep.mubr.bf16.mxu0 %v1736_v34 }
 0x312   :  { %2126 = vmatmul.mubr.bf16.gmra.mrb[124].mxu0 %v1735_v1 }
 0x333   :  { %v1977_v37 = vpop.f32.mrb[64].mxu0 }
 0x334   :  { %v1978_v20 = vadd.f32 %v1977_v37, %v3727_v21  ;;  %v1979_v38 = vpop.f32.mrb[65].mxu0 }
 0x335   :  { %v1980_v39 = vadd.f32 %v1979_v38, %v3730_v35  ;;  %v1981_v40 = vpop.f32.mrb[66].mxu0 }
 0x336   :  { %v1982_v41 = vadd.f32 %v1981_v40, %v3727_v21  ;;  %v1983_v42 = vpop.f32.mrb[67].mxu0  ;;  %v2136_v0 = vmax.f32 %v1978_v20, 0.0 }
 0x337   :  { %v1984_v43 = vadd.f32 %v1983_v42, %v3730_v35  ;;  %v2137_v45 = vmax.f32 %v1980_v39, 0.0 }
 0x338   :  { %v2138_v44 = vmax.f32 %v1982_v41, 0.0 }
 0x339   :  { %v2139_v63 = vmax.f32 %v1984_v43, 0.0 }
 0x33a   :  { %v2200_v46 = vpack.c.bf16 %v2138_v44, %v2136_v0 }
 0x33b   :  { %v2201_v47 = vpack.c.bf16 %v2139_v63, %v2137_v45 }
 0x33d   :  { %v1987_v2 = vpop.f32.mrb[68].mxu0  ;;  %2399 = vmatprep.mubr.bf16.mxu1 %v2201_v47 }
 0x33e   :  { %v1988_v48 = vadd.f32 %v1987_v2, %v3727_v21  ;;  %v1989_v49 = vpop.f32.mrb[69].mxu0  ;;  %2400 = vmatmul.mubr.bf16.vlgmr.msra.gmra.mrb[64].mxu1 %v2200_v46 }
 0x33f   :  { %v1990_v50 = vadd.f32 %v1989_v49, %v3730_v35  ;;  %v1991_v51 = vpop.f32.mrb[70].mxu0 }
 0x340   :  { %v1992_v52 = vadd.f32 %v1991_v51, %v3727_v21  ;;  %v1993_v53 = vpop.f32.mrb[71].mxu0  ;;  %v2140_v56 = vmax.f32 %v1988_v48, 0.0 }
 0x341   :  { %v1994_v55 = vadd.f32 %v1993_v53, %v3730_v35  ;;  %v2141_v59 = vmax.f32 %v1990_v50, 0.0 }
 0x342   :  { %v2142_v58 = vmax.f32 %v1992_v52, 0.0 }
 0x343   :  { %v2143_v60 = vmax.f32 %v1994_v55, 0.0 }
 0x344   :  { %v2202_v61 = vpack.c.bf16 %v2142_v58, %v2140_v56 }
 0x345   :  { %v2203_v62 = vpack.c.bf16 %v2143_v60, %v2141_v59 }
 0x347   :  { %2407 = vmatprep.mubr.bf16.mxu1 %v2203_v62 }
 0x348   :  { %2408 = vmatmul.mubr.bf16.gmra.mrb[68].mxu1 %v2202_v61 }
 0x34b   :  { %v1997_v3 = vpop.f32.mrb[72].mxu0 }
 0x34c   :  { %v1998_v4 = vadd.f32 %v1997_v3, %v3727_v21  ;;  %v1999_v9 = vpop.f32.mrb[73].mxu0 }
 0x34d   :  { %v2000_v10 = vadd.f32 %v1999_v9, %v3730_v35  ;;  %v2001_v11 = vpop.f32.mrb[74].mxu0 }
 0x34e   :  { %v2002_v12 = vadd.f32 %v2001_v11, %v3727_v21  ;;  %v2003_v13 = vpop.f32.mrb[75].mxu0  ;;  %v2144_v15 = vmax.f32 %v1998_v4, 0.0 }
 0x34f   :  { %v2004_v14 = vadd.f32 %v2003_v13, %v3730_v35  ;;  %v2145_v7 = vmax.f32 %v2000_v10, 0.0 }
 0x350   :  { %v2146_v16 = vmax.f32 %v2002_v12, 0.0 }
 0x351   :  { %v2147_v18 = vmax.f32 %v2004_v14, 0.0 }
 0x352   :  { %v2204_v8 = vpack.c.bf16 %v2146_v16, %v2144_v15 }
 0x353   :  { %v2205_v19 = vpack.c.bf16 %v2147_v18, %v2145_v7 }
 0x355   :  { %v2007_v5 = vpop.f32.mrb[76].mxu0  ;;  %2415 = vmatprep.mubr.bf16.mxu1 %v2205_v19 }
 0x356   :  { %v2008_v6 = vadd.f32 %v2007_v5, %v3727_v21  ;;  %v2009_v17 = vpop.f32.mrb[77].mxu0  ;;  %2416 = vmatmul.mubr.bf16.gmra.mrb[72].mxu1 %v2204_v8 }
 0x357   :  { %v2010_v22 = vadd.f32 %v2009_v17, %v3730_v35  ;;  %v2011_v54 = vpop.f32.mrb[78].mxu0 }
 0x358   :  { %v2012_v57 = vadd.f32 %v2011_v54, %v3727_v21  ;;  %v2013_v23 = vpop.f32.mrb[79].mxu0  ;;  %v2148_v25 = vmax.f32 %v2008_v6, 0.0 }
 0x359   :  { %v2014_v24 = vadd.f32 %v2013_v23, %v3730_v35  ;;  %v2149_v27 = vmax.f32 %v2010_v22, 0.0 }
 0x35a   :  { %v2150_v26 = vmax.f32 %v2012_v57, 0.0 }
 0x35b   :  { %v2151_v28 = vmax.f32 %v2014_v24, 0.0 }
 0x35c   :  { %v2206_v29 = vpack.c.bf16 %v2150_v26, %v2148_v25 }
 0x35d   :  { %v2207_v30 = vpack.c.bf16 %v2151_v28, %v2149_v27 }
 0x35f   :  { %2423 = vmatprep.mubr.bf16.mxu1 %v2207_v30 }
 0x360   :  { %2424 = vmatmul.mubr.bf16.gmra.mrb[76].mxu1 %v2206_v29 }
 0x363   :  { %v2017_v31 = vpop.f32.mrb[80].mxu0 }
 0x364   :  { %v2018_v32 = vadd.f32 %v2017_v31, %v3727_v21  ;;  %v2019_v33 = vpop.f32.mrb[81].mxu0 }
 0x365   :  { %v2020_v1 = vadd.f32 %v2019_v33, %v3730_v35  ;;  %v2021_v34 = vpop.f32.mrb[82].mxu0 }
 0x366   :  { %v2022_v36 = vadd.f32 %v2021_v34, %v3727_v21  ;;  %v2023_v37 = vpop.f32.mrb[83].mxu0  ;;  %v2152_v38 = vmax.f32 %v2018_v32, 0.0 }
 0x367   :  { %v2024_v20 = vadd.f32 %v2023_v37, %v3730_v35  ;;  %v2153_v40 = vmax.f32 %v2020_v1, 0.0 }
 0x368   :  { %v2154_v39 = vmax.f32 %v2022_v36, 0.0 }
 0x369   :  { %v2155_v41 = vmax.f32 %v2024_v20, 0.0 }
 0x36a   :  { %v2208_v42 = vpack.c.bf16 %v2154_v39, %v2152_v38 }
 0x36b   :  { %v2209_v43 = vpack.c.bf16 %v2155_v41, %v2153_v40 }
 0x36d   :  { %v2027_v0 = vpop.f32.mrb[84].mxu0  ;;  %2431 = vmatprep.mubr.bf16.mxu1 %v2209_v43 }
 0x36e   :  { %v2028_v44 = vadd.f32 %v2027_v0, %v3727_v21  ;;  %v2029_v45 = vpop.f32.mrb[85].mxu0  ;;  %2432 = vmatmul.mubr.bf16.gmra.mrb[80].mxu1 %v2208_v42 }
 0x36f   :  { %v2030_v63 = vadd.f32 %v2029_v45, %v3730_v35  ;;  %v2031_v46 = vpop.f32.mrb[86].mxu0 }
 0x370   :  { %v2032_v47 = vadd.f32 %v2031_v46, %v3727_v21  ;;  %v2033_v2 = vpop.f32.mrb[87].mxu0  ;;  %v2156_v49 = vmax.f32 %v2028_v44, 0.0 }
 0x371   :  { %v2034_v48 = vadd.f32 %v2033_v2, %v3730_v35  ;;  %v2157_v51 = vmax.f32 %v2030_v63, 0.0 }
 0x372   :  { %v2158_v50 = vmax.f32 %v2032_v47, 0.0 }
 0x373   :  { %v2159_v52 = vmax.f32 %v2034_v48, 0.0 }
 0x374   :  { %v2210_v53 = vpack.c.bf16 %v2158_v50, %v2156_v49 }
 0x375   :  { %v2211_v55 = vpack.c.bf16 %v2159_v52, %v2157_v51 }
 0x377   :  { %2439 = vmatprep.mubr.bf16.mxu1 %v2211_v55 }
 0x378   :  { %2440 = vmatmul.mubr.bf16.gmra.mrb[84].mxu1 %v2210_v53 }
 0x37b   :  { %v2037_v56 = vpop.f32.mrb[88].mxu0 }
 0x37c   :  { %v2038_v58 = vadd.f32 %v2037_v56, %v3727_v21  ;;  %v2039_v59 = vpop.f32.mrb[89].mxu0 }
 0x37d   :  { %v2040_v60 = vadd.f32 %v2039_v59, %v3730_v35  ;;  %v2041_v61 = vpop.f32.mrb[90].mxu0 }
 0x37e   :  { %v2042_v62 = vadd.f32 %v2041_v61, %v3727_v21  ;;  %v2043_v3 = vpop.f32.mrb[91].mxu0  ;;  %v2160_v9 = vmax.f32 %v2038_v58, 0.0 }
 0x37f   :  { %v2044_v4 = vadd.f32 %v2043_v3, %v3730_v35  ;;  %v2161_v11 = vmax.f32 %v2040_v60, 0.0 }
 0x380   :  { %v2162_v10 = vmax.f32 %v2042_v62, 0.0 }
 0x381   :  { %v2163_v12 = vmax.f32 %v2044_v4, 0.0 }
 0x382   :  { %v2212_v13 = vpack.c.bf16 %v2162_v10, %v2160_v9 }
 0x383   :  { %v2213_v14 = vpack.c.bf16 %v2163_v12, %v2161_v11 }
 0x385   :  { %v2047_v15 = vpop.f32.mrb[92].mxu0  ;;  %2447 = vmatprep.mubr.bf16.mxu1 %v2213_v14 }
 0x386   :  { %v2048_v16 = vadd.f32 %v2047_v15, %v3727_v21  ;;  %v2049_v7 = vpop.f32.mrb[93].mxu0  ;;  %2448 = vmatmul.mubr.bf16.gmra.mrb[88].mxu1 %v2212_v13 }
 0x387   :  { %v2050_v18 = vadd.f32 %v2049_v7, %v3730_v35  ;;  %v2051_v8 = vpop.f32.mrb[94].mxu0 }
 0x388   :  { %v2052_v19 = vadd.f32 %v2051_v8, %v3727_v21  ;;  %v2053_v5 = vpop.f32.mrb[95].mxu0  ;;  %v2164_v17 = vmax.f32 %v2048_v16, 0.0 }
 0x389   :  { %v2054_v6 = vadd.f32 %v2053_v5, %v3730_v35  ;;  %v2165_v54 = vmax.f32 %v2050_v18, 0.0 }
 0x38a   :  { %v2166_v22 = vmax.f32 %v2052_v19, 0.0 }
 0x38b   :  { %v2167_v57 = vmax.f32 %v2054_v6, 0.0 }
 0x38c   :  { %v2214_v23 = vpack.c.bf16 %v2166_v22, %v2164_v17 }
 0x38d   :  { %v2215_v24 = vpack.c.bf16 %v2167_v57, %v2165_v54 }
 0x38f   :  { %2455 = vmatprep.mubr.bf16.mxu1 %v2215_v24 }
 0x390   :  { %2456 = vmatmul.mubr.bf16.gmra.mrb[92].mxu1 %v2214_v23 }
 0x393   :  { %v2057_v25 = vpop.f32.mrb[96].mxu0 }
 0x394   :  { %v2058_v26 = vadd.f32 %v2057_v25, %v3727_v21  ;;  %v2059_v27 = vpop.f32.mrb[97].mxu0 }
 0x395   :  { %v2060_v28 = vadd.f32 %v2059_v27, %v3730_v35  ;;  %v2061_v29 = vpop.f32.mrb[98].mxu0 }
 0x396   :  { %v2062_v30 = vadd.f32 %v2061_v29, %v3727_v21  ;;  %v2063_v31 = vpop.f32.mrb[99].mxu0  ;;  %v2168_v33 = vmax.f32 %v2058_v26, 0.0 }
 0x397   :  { %v2064_v32 = vadd.f32 %v2063_v31, %v3730_v35  ;;  %v2169_v34 = vmax.f32 %v2060_v28, 0.0 }
 0x398   :  { %v2170_v1 = vmax.f32 %v2062_v30, 0.0 }
 0x399   :  { %v2171_v36 = vmax.f32 %v2064_v32, 0.0 }
 0x39a   :  { %v2216_v37 = vpack.c.bf16 %v2170_v1, %v2168_v33 }
 0x39b   :  { %v2217_v20 = vpack.c.bf16 %v2171_v36, %v2169_v34 }
 0x39d   :  { %v2067_v38 = vpop.f32.mrb[100].mxu0  ;;  %2463 = vmatprep.mubr.bf16.mxu1 %v2217_v20 }
 0x39e   :  { %v2068_v39 = vadd.f32 %v2067_v38, %v3727_v21  ;;  %v2069_v40 = vpop.f32.mrb[101].mxu0  ;;  %2464 = vmatmul.mubr.bf16.gmra.mrb[96].mxu1 %v2216_v37 }
 0x39f   :  { %v2070_v41 = vadd.f32 %v2069_v40, %v3730_v35  ;;  %v2071_v42 = vpop.f32.mrb[102].mxu0 }
 0x3a0   :  { %v2072_v43 = vadd.f32 %v2071_v42, %v3727_v21  ;;  %v2073_v0 = vpop.f32.mrb[103].mxu0  ;;  %v2172_v45 = vmax.f32 %v2068_v39, 0.0 }
 0x3a1   :  { %v2074_v44 = vadd.f32 %v2073_v0, %v3730_v35  ;;  %v2173_v46 = vmax.f32 %v2070_v41, 0.0 }
 0x3a2   :  { %v2174_v63 = vmax.f32 %v2072_v43, 0.0 }
 0x3a3   :  { %v2175_v47 = vmax.f32 %v2074_v44, 0.0 }
 0x3a4   :  { %v2218_v2 = vpack.c.bf16 %v2174_v63, %v2172_v45 }
 0x3a5   :  { %v2219_v48 = vpack.c.bf16 %v2175_v47, %v2173_v46 }
 0x3a7   :  { %2471 = vmatprep.mubr.bf16.mxu1 %v2219_v48 }
 0x3a8   :  { %2472 = vmatmul.mubr.bf16.gmra.mrb[100].mxu1 %v2218_v2 }
 0x3ab   :  { %v2077_v49 = vpop.f32.mrb[104].mxu0 }
 0x3ac   :  { %v2078_v50 = vadd.f32 %v2077_v49, %v3727_v21  ;;  %v2079_v51 = vpop.f32.mrb[105].mxu0 }
 0x3ad   :  { %v2080_v52 = vadd.f32 %v2079_v51, %v3730_v35  ;;  %v2081_v53 = vpop.f32.mrb[106].mxu0 }
 0x3ae   :  { %v2082_v55 = vadd.f32 %v2081_v53, %v3727_v21  ;;  %v2083_v56 = vpop.f32.mrb[107].mxu0  ;;  %v2176_v59 = vmax.f32 %v2078_v50, 0.0 }
 0x3af   :  { %v2084_v58 = vadd.f32 %v2083_v56, %v3730_v35  ;;  %v2177_v61 = vmax.f32 %v2080_v52, 0.0 }
 0x3b0   :  { %v2178_v60 = vmax.f32 %v2082_v55, 0.0 }
 0x3b1   :  { %v2179_v62 = vmax.f32 %v2084_v58, 0.0 }
 0x3b2   :  { %v2220_v3 = vpack.c.bf16 %v2178_v60, %v2176_v59 }
 0x3b3   :  { %v2221_v4 = vpack.c.bf16 %v2179_v62, %v2177_v61 }
 0x3b5   :  { %v2087_v9 = vpop.f32.mrb[108].mxu0  ;;  %2479 = vmatprep.mubr.bf16.mxu1 %v2221_v4 }
 0x3b6   :  { %v2088_v10 = vadd.f32 %v2087_v9, %v3727_v21  ;;  %v2089_v11 = vpop.f32.mrb[109].mxu0  ;;  %2480 = vmatmul.mubr.bf16.gmra.mrb[104].mxu1 %v2220_v3 }
 0x3b7   :  { %v2090_v12 = vadd.f32 %v2089_v11, %v3730_v35  ;;  %v2091_v13 = vpop.f32.mrb[110].mxu0 }
 0x3b8   :  { %v2092_v14 = vadd.f32 %v2091_v13, %v3727_v21  ;;  %v2093_v15 = vpop.f32.mrb[111].mxu0  ;;  %v2180_v7 = vmax.f32 %v2088_v10, 0.0 }
 0x3b9   :  { %v2094_v16 = vadd.f32 %v2093_v15, %v3730_v35  ;;  %v2181_v8 = vmax.f32 %v2090_v12, 0.0 }
 0x3ba   :  { %v2182_v18 = vmax.f32 %v2092_v14, 0.0 }
 0x3bb   :  { %v2183_v19 = vmax.f32 %v2094_v16, 0.0 }
 0x3bc   :  { %v2222_v5 = vpack.c.bf16 %v2182_v18, %v2180_v7  ;;  %v3799_v18 = vld [vmem:[%s3850_s5] ss:$0 sm:$0xff]  ;;  %s3113_s5 = smov [#allocation5]  }
 0x3bd   :  { %v2223_v6 = vpack.c.bf16 %v2183_v19, %v2181_v8  ;;  %s2611_s3 = sshll.u32 %s3113_s5, 4  ;;  %s2612_s3 = int_to_ptr.vmem [resolvable:$true] %s2611_s3 }
 0x3be   :  { %s3082_s15 = scalar_lea.vmem %s2612_s3, 128  ;;  %p3087_p9 = scmp.lt.s32.totalorder %s2612_s3, %s2612_s3 }
 0x3bf   :  { %2487 = vmatprep.mubr.bf16.mxu1 %v2223_v6  ;;  %p3083_p8 = scmp.ne.s32.totalorder %s2612_s3, %s3082_s15  ;;  %p3088_p10 = scmp.lt.s32.totalorder %s3082_s15, %s3082_s15 }
 0x3c0   :  { %2488 = vmatmul.mubr.bf16.gmra.mrb[108].mxu1 %v2222_v5 }
 0x3c1   :  { %p3089_p11 = por %p3088_p10, %p3087_p9 }
 0x3c3   :  { %v2097_v17 = vpop.f32.mrb[112].mxu0  ;;  %p3090_p12 = pnand %p3089_p11, %p3083_p8 }
 0x3c4   :  { %v2098_v22 = vadd.f32 %v2097_v17, %v3727_v21  ;;  %v2099_v54 = vpop.f32.mrb[113].mxu0 }
 0x3c5   :  { %v2100_v57 = vadd.f32 %v2099_v54, %v3730_v35  ;;  %v2101_v23 = vpop.f32.mrb[114].mxu0 }
 0x3c6   :  { %v2102_v24 = vadd.f32 %v2101_v23, %v3727_v21  ;;  %v2103_v25 = vpop.f32.mrb[115].mxu0  ;;  %v2184_v27 = vmax.f32 %v2098_v22, 0.0 }
 0x3c7   :  { %v2104_v26 = vadd.f32 %v2103_v25, %v3730_v35  ;;  %v2185_v29 = vmax.f32 %v2100_v57, 0.0 }
 0x3c8   :  { %v2186_v28 = vmax.f32 %v2102_v24, 0.0 }
 0x3c9   :  { %v2187_v30 = vmax.f32 %v2104_v26, 0.0 }
 0x3ca   :  { %v2224_v31 = vpack.c.bf16 %v2186_v28, %v2184_v27 }
 0x3cb   :  { %v2225_v32 = vpack.c.bf16 %v2187_v30, %v2185_v29 }
 0x3cd   :  { %v2107_v33 = vpop.f32.mrb[116].mxu0  ;;  %2495 = vmatprep.mubr.bf16.mxu1 %v2225_v32 }
 0x3ce   :  { %v2108_v1 = vadd.f32 %v2107_v33, %v3727_v21  ;;  %v2109_v34 = vpop.f32.mrb[117].mxu0  ;;  %2496 = vmatmul.mubr.bf16.gmra.mrb[112].mxu1 %v2224_v31 }
 0x3cf   :  { %v2110_v36 = vadd.f32 %v2109_v34, %v3730_v35  ;;  %v2111_v37 = vpop.f32.mrb[118].mxu0 }
 0x3d0   :  { %v2112_v20 = vadd.f32 %v2111_v37, %v3727_v21  ;;  %v2113_v38 = vpop.f32.mrb[119].mxu0  ;;  %v2188_v40 = vmax.f32 %v2108_v1, 0.0 }
 0x3d1   :  { %v2114_v39 = vadd.f32 %v2113_v38, %v3730_v35  ;;  %v2189_v42 = vmax.f32 %v2110_v36, 0.0 }
 0x3d2   :  { %v2190_v41 = vmax.f32 %v2112_v20, 0.0 }
 0x3d3   :  { %v2191_v43 = vmax.f32 %v2114_v39, 0.0 }
 0x3d4   :  { %v2226_v0 = vpack.c.bf16 %v2190_v41, %v2188_v40 }
 0x3d5   :  { %v2227_v44 = vpack.c.bf16 %v2191_v43, %v2189_v42 }
 0x3d7   :  { %2503 = vmatprep.mubr.bf16.mxu1 %v2227_v44 }
 0x3d8   :  { %2504 = vmatmul.mubr.bf16.gmra.mrb[116].mxu1 %v2226_v0 }
 0x3db   :  { %v2117_v45 = vpop.f32.mrb[120].mxu0 }
 0x3dc   :  { %v2118_v63 = vadd.f32 %v2117_v45, %v3727_v21  ;;  %v2119_v46 = vpop.f32.mrb[121].mxu0 }
 0x3dd   :  { %v2120_v47 = vadd.f32 %v2119_v46, %v3730_v35  ;;  %v2121_v2 = vpop.f32.mrb[122].mxu0 }
 0x3de   :  { %v2122_v48 = vadd.f32 %v2121_v2, %v3727_v21  ;;  %v2123_v49 = vpop.f32.mrb[123].mxu0  ;;  %v2192_v51 = vmax.f32 %v2118_v63, 0.0 }
 0x3df   :  { %v2124_v50 = vadd.f32 %v2123_v49, %v3730_v35  ;;  %v2193_v53 = vmax.f32 %v2120_v47, 0.0 }
 0x3e0   :  { %v2194_v52 = vmax.f32 %v2122_v48, 0.0 }
 0x3e1   :  { %v2195_v55 = vmax.f32 %v2124_v50, 0.0 }
 0x3e2   :  { %v2228_v56 = vpack.c.bf16 %v2194_v52, %v2192_v51 }
 0x3e3   :  { %v2229_v58 = vpack.c.bf16 %v2195_v55, %v2193_v53 }
 0x3e5   :  { %v2127_v59 = vpop.f32.mrb[124].mxu0  ;;  %2511 = vmatprep.mubr.bf16.mxu1 %v2229_v58 }
 0x3e6   :  { %v2128_v60 = vadd.f32 %v2127_v59, %v3727_v21  ;;  %v2129_v61 = vpop.f32.mrb[125].mxu0  ;;  %2512 = vmatmul.mubr.bf16.gmra.mrb[120].mxu1 %v2228_v56 }
 0x3e7   :  { %v2130_v62 = vadd.f32 %v2129_v61, %v3730_v35  ;;  %v2131_v3 = vpop.f32.mrb[126].mxu0 }
 0x3e8   :  { %v2132_v4 = vadd.f32 %v2131_v3, %v3727_v21  ;;  %v2133_v9 = vpop.f32.mrb[127].mxu0  ;;  %v2196_v11 = vmax.f32 %v2128_v60, 0.0 }
 0x3e9   :  { %v2134_v10 = vadd.f32 %v2133_v9, %v3730_v35  ;;  %v2197_v13 = vmax.f32 %v2130_v62, 0.0 }
 0x3ea   :  { %v2198_v12 = vmax.f32 %v2132_v4, 0.0 }
 0x3eb   :  { %v2199_v14 = vmax.f32 %v2134_v10, 0.0 }
 0x3ec   :  { %v2230_v15 = vpack.c.bf16 %v2198_v12, %v2196_v11 }
 0x3ed   :  { %v2231_v16 = vpack.c.bf16 %v2199_v14, %v2197_v13 }
 0x3ef   :  { %2519 = vmatprep.mubr.bf16.mxu1 %v2231_v16 }
 0x3f0   :  { %2520 = vmatmul.mubr.bf16.gmra.mrb[124].mxu1 %v2230_v15 }
 0x411   :  { %v2753_v7 = vpop.f32.mrb[64].mxu1 }
 0x412   :  { %v2754_v8 = vpop.f32.mrb[65].mxu1 }
 0x413   :  { %v2755_v19 = vadd.f32 %v2754_v8, %v2753_v7  ;;  %v2756_v21 = vpop.f32.mrb[66].mxu1 }
 0x414   :  { %v2757_v5 = vpop.f32.mrb[67].mxu1 }
 0x415   :  { %v2402_v35 = vadd.f32 %v2755_v19, %v3799_v18  ;;  %v2758_v6 = vadd.f32 %v2757_v5, %v2756_v21 }
 0x417   :  { %2528 = vxpose.xlu1.b32.start [1/16] (narrow) %v2402_v35, 8  ;;  %v2405_v17 = vadd.f32 %v2758_v6, %v3799_v18 }
 0x41b   :  { %v2759_v22 = vpop.f32.mrb[68].mxu1  ;;  %2529 = vxpose.xlu1.b32.cont [2/16] (narrow) %v2405_v17, 8 }
 0x41c   :  { %v2760_v54 = vpop.f32.mrb[69].mxu1 }
 0x41d   :  { %v2761_v57 = vadd.f32 %v2760_v54, %v2759_v22  ;;  %v2762_v23 = vpop.f32.mrb[70].mxu1 }
 0x41e   :  { %v2763_v24 = vpop.f32.mrb[71].mxu1 }
 0x41f   :  { %v2410_v25 = vadd.f32 %v2761_v57, %v3799_v18  ;;  %v2764_v26 = vadd.f32 %v2763_v24, %v2762_v23 }
 0x421   :  { %2530 = vxpose.xlu1.b32.cont [3/16] (narrow) %v2410_v25, 8  ;;  %v2413_v27 = vadd.f32 %v2764_v26, %v3799_v18 }
 0x425   :  { %2531 = vxpose.xlu1.b32.cont [4/16] (narrow) %v2413_v27, 8 }
 0x429   :  { %v2765_v28 = vpop.f32.mrb[72].mxu1 }
 0x42a   :  { %v2766_v29 = vpop.f32.mrb[73].mxu1 }
 0x42b   :  { %v2767_v30 = vadd.f32 %v2766_v29, %v2765_v28  ;;  %v2768_v31 = vpop.f32.mrb[74].mxu1 }
 0x42c   :  { %v2769_v32 = vpop.f32.mrb[75].mxu1 }
 0x42d   :  { %v2418_v33 = vadd.f32 %v2767_v30, %v3799_v18  ;;  %v2770_v1 = vadd.f32 %v2769_v32, %v2768_v31 }
 0x42f   :  { %2532 = vxpose.xlu1.b32.cont [5/16] (narrow) %v2418_v33, 8  ;;  %v2421_v34 = vadd.f32 %v2770_v1, %v3799_v18 }
 0x433   :  { %v2771_v36 = vpop.f32.mrb[76].mxu1  ;;  %2533 = vxpose.xlu1.b32.cont [6/16] (narrow) %v2421_v34, 8 }
 0x434   :  { %v2772_v37 = vpop.f32.mrb[77].mxu1 }
 0x435   :  { %v2773_v20 = vadd.f32 %v2772_v37, %v2771_v36  ;;  %v2774_v38 = vpop.f32.mrb[78].mxu1 }
 0x436   :  { %v2775_v39 = vpop.f32.mrb[79].mxu1 }
 0x437   :  { %v2426_v40 = vadd.f32 %v2773_v20, %v3799_v18  ;;  %v2776_v41 = vadd.f32 %v2775_v39, %v2774_v38 }
 0x439   :  { %2534 = vxpose.xlu1.b32.cont [7/16] (narrow) %v2426_v40, 8  ;;  %v2429_v42 = vadd.f32 %v2776_v41, %v3799_v18 }
 0x43d   :  { %2535 = vxpose.xlu1.b32.cont [8/16] (narrow) %v2429_v42, 8 }
 0x441   :  { %v2777_v43 = vpop.f32.mrb[80].mxu1 }
 0x442   :  { %v2778_v0 = vpop.f32.mrb[81].mxu1 }
 0x443   :  { %v2779_v44 = vadd.f32 %v2778_v0, %v2777_v43  ;;  %v2780_v45 = vpop.f32.mrb[82].mxu1 }
 0x444   :  { %v2781_v63 = vpop.f32.mrb[83].mxu1 }
 0x445   :  { %v2434_v46 = vadd.f32 %v2779_v44, %v3799_v18  ;;  %v2782_v47 = vadd.f32 %v2781_v63, %v2780_v45 }
 0x447   :  { %2536 = vxpose.xlu1.b32.cont [9/16] (narrow) %v2434_v46, 8  ;;  %v2437_v2 = vadd.f32 %v2782_v47, %v3799_v18 }
 0x44b   :  { %v2783_v48 = vpop.f32.mrb[84].mxu1  ;;  %2537 = vxpose.xlu1.b32.cont [10/16] (narrow) %v2437_v2, 8 }
 0x44c   :  { %v2784_v49 = vpop.f32.mrb[85].mxu1 }
 0x44d   :  { %v2785_v50 = vadd.f32 %v2784_v49, %v2783_v48  ;;  %v2786_v51 = vpop.f32.mrb[86].mxu1 }
 0x44e   :  { %v2787_v52 = vpop.f32.mrb[87].mxu1 }
 0x44f   :  { %v2442_v53 = vadd.f32 %v2785_v50, %v3799_v18  ;;  %v2788_v55 = vadd.f32 %v2787_v52, %v2786_v51 }
 0x451   :  { %2538 = vxpose.xlu1.b32.cont [11/16] (narrow) %v2442_v53, 8  ;;  %v2445_v56 = vadd.f32 %v2788_v55, %v3799_v18 }
 0x455   :  { %2539 = vxpose.xlu1.b32.cont [12/16] (narrow) %v2445_v56, 8 }
 0x459   :  { %v2789_v58 = vpop.f32.mrb[88].mxu1 }
 0x45a   :  { %v2790_v59 = vpop.f32.mrb[89].mxu1 }
 0x45b   :  { %v2791_v60 = vadd.f32 %v2790_v59, %v2789_v58  ;;  %v2792_v61 = vpop.f32.mrb[90].mxu1 }
 0x45c   :  { %v2793_v62 = vpop.f32.mrb[91].mxu1 }
 0x45d   :  { %v2450_v3 = vadd.f32 %v2791_v60, %v3799_v18  ;;  %v2794_v4 = vadd.f32 %v2793_v62, %v2792_v61 }
 0x45f   :  { %2540 = vxpose.xlu1.b32.cont [13/16] (narrow) %v2450_v3, 8  ;;  %v2453_v9 = vadd.f32 %v2794_v4, %v3799_v18 }
 0x463   :  { %v2795_v10 = vpop.f32.mrb[92].mxu1  ;;  %2541 = vxpose.xlu1.b32.cont [14/16] (narrow) %v2453_v9, 8 }
 0x464   :  { %v2796_v11 = vpop.f32.mrb[93].mxu1 }
 0x465   :  { %v2797_v12 = vadd.f32 %v2796_v11, %v2795_v10  ;;  %v2798_v13 = vpop.f32.mrb[94].mxu1 }
 0x466   :  { %v2799_v14 = vpop.f32.mrb[95].mxu1 }
 0x467   :  { %v2458_v15 = vadd.f32 %v2797_v12, %v3799_v18  ;;  %v2800_v16 = vadd.f32 %v2799_v14, %v2798_v13 }
 0x469   :  { %2542 = vxpose.xlu1.b32.cont [15/16] (narrow) %v2458_v15, 8  ;;  %v2461_v7 = vadd.f32 %v2800_v16, %v3799_v18 }
 0x46d   :  { %2543 = vxpose.xlu1.b32.end [16/16] (narrow) %v2461_v7, 8 }
 0x471   :  { %v2801_v8 = vpop.f32.mrb[96].mxu1 }
 0x472   :  { %v2802_v19 = vpop.f32.mrb[97].mxu1 }
 0x473   :  { %v2803_v21 = vadd.f32 %v2802_v19, %v2801_v8  ;;  %v2804_v5 = vpop.f32.mrb[98].mxu1 }
 0x474   :  { %v2805_v35 = vpop.f32.mrb[99].mxu1 }
 0x475   :  { %v2466_v6 = vadd.f32 %v2803_v21, %v3799_v18  ;;  %v2806_v17 = vadd.f32 %v2805_v35, %v2804_v5 }
 0x477   :  { %2560 = vxpose.xlu0.b32.start [1/16] (narrow) %v2466_v6, 8  ;;  %v2469_v22 = vadd.f32 %v2806_v17, %v3799_v18 }
 0x47b   :  { %v2807_v54 = vpop.f32.mrb[100].mxu1  ;;  %2561 = vxpose.xlu0.b32.cont [2/16] (narrow) %v2469_v22, 8 }
 0x47c   :  { %v2808_v57 = vpop.f32.mrb[101].mxu1 }
 0x47d   :  { %v2809_v23 = vadd.f32 %v2808_v57, %v2807_v54  ;;  %v2810_v24 = vpop.f32.mrb[102].mxu1 }
 0x47e   :  { %v2811_v25 = vpop.f32.mrb[103].mxu1 }
 0x47f   :  { %v2474_v26 = vadd.f32 %v2809_v23, %v3799_v18  ;;  %v2812_v27 = vadd.f32 %v2811_v25, %v2810_v24 }
 0x481   :  { %2562 = vxpose.xlu0.b32.cont [3/16] (narrow) %v2474_v26, 8  ;;  %v2477_v28 = vadd.f32 %v2812_v27, %v3799_v18 }
 0x485   :  { %2563 = vxpose.xlu0.b32.cont [4/16] (narrow) %v2477_v28, 8 }
 0x489   :  { %v2813_v29 = vpop.f32.mrb[104].mxu1 }
 0x48a   :  { %v2814_v30 = vpop.f32.mrb[105].mxu1 }
 0x48b   :  { %v2815_v31 = vadd.f32 %v2814_v30, %v2813_v29  ;;  %v2816_v32 = vpop.f32.mrb[106].mxu1 }
 0x48c   :  { %v2817_v33 = vpop.f32.mrb[107].mxu1 }
 0x48d   :  { %v2482_v1 = vadd.f32 %v2815_v31, %v3799_v18  ;;  %v2818_v34 = vadd.f32 %v2817_v33, %v2816_v32 }
 0x48f   :  { %2564 = vxpose.xlu0.b32.cont [5/16] (narrow) %v2482_v1, 8  ;;  %v2485_v36 = vadd.f32 %v2818_v34, %v3799_v18 }
 0x493   :  { %v2819_v37 = vpop.f32.mrb[108].mxu1  ;;  %2565 = vxpose.xlu0.b32.cont [6/16] (narrow) %v2485_v36, 8 }
 0x494   :  { %v2820_v20 = vpop.f32.mrb[109].mxu1 }
 0x495   :  { %v2821_v38 = vadd.f32 %v2820_v20, %v2819_v37  ;;  %v2822_v39 = vpop.f32.mrb[110].mxu1 }
 0x496   :  { %v2823_v40 = vpop.f32.mrb[111].mxu1 }
 0x497   :  { %v2490_v41 = vadd.f32 %v2821_v38, %v3799_v18  ;;  %v2824_v42 = vadd.f32 %v2823_v40, %v2822_v39 }
 0x499   :  { %2566 = vxpose.xlu0.b32.cont [7/16] (narrow) %v2490_v41, 8  ;;  %v2493_v43 = vadd.f32 %v2824_v42, %v3799_v18 }
 0x49d   :  { %2567 = vxpose.xlu0.b32.cont [8/16] (narrow) %v2493_v43, 8 }
 0x4a1   :  { %v2825_v0 = vpop.f32.mrb[112].mxu1 }
 0x4a2   :  { %v2826_v44 = vpop.f32.mrb[113].mxu1 }
 0x4a3   :  { %v2827_v45 = vadd.f32 %v2826_v44, %v2825_v0  ;;  %v2828_v63 = vpop.f32.mrb[114].mxu1 }
 0x4a4   :  { %v2829_v46 = vpop.f32.mrb[115].mxu1 }
 0x4a5   :  { %v2498_v47 = vadd.f32 %v2827_v45, %v3799_v18  ;;  %v2830_v2 = vadd.f32 %v2829_v46, %v2828_v63 }
 0x4a7   :  { %2568 = vxpose.xlu0.b32.cont [9/16] (narrow) %v2498_v47, 8  ;;  %v2501_v48 = vadd.f32 %v2830_v2, %v3799_v18 }
 0x4ab   :  { %v2831_v49 = vpop.f32.mrb[116].mxu1  ;;  %2569 = vxpose.xlu0.b32.cont [10/16] (narrow) %v2501_v48, 8 }
 0x4ac   :  { %v2832_v50 = vpop.f32.mrb[117].mxu1 }
 0x4ad   :  { %v2833_v51 = vadd.f32 %v2832_v50, %v2831_v49  ;;  %v2834_v52 = vpop.f32.mrb[118].mxu1 }
 0x4ae   :  { %v2835_v53 = vpop.f32.mrb[119].mxu1 }
 0x4af   :  { %v2506_v55 = vadd.f32 %v2833_v51, %v3799_v18  ;;  %v2836_v56 = vadd.f32 %v2835_v53, %v2834_v52 }
 0x4b1   :  { %2570 = vxpose.xlu0.b32.cont [11/16] (narrow) %v2506_v55, 8  ;;  %v2509_v58 = vadd.f32 %v2836_v56, %v3799_v18  ;;  %v2544_v19 = vpop.trf.xlu1 }
 0x4b2   :  { %v2592_v21 = vmul.f32 0.5, %v2544_v19 }
 0x4b4   :  { %3056 = vtanh.f32 %v2592_v21 }
 0x4b5   :  { %2571 = vxpose.xlu0.b32.cont [12/16] (narrow) %v2509_v58, 8 }
 0x4b9   :  { %v2837_v59 = vpop.f32.mrb[120].mxu1 }
 0x4ba   :  { %v2838_v60 = vpop.f32.mrb[121].mxu1 }
 0x4bb   :  { %v2839_v61 = vadd.f32 %v2838_v60, %v2837_v59  ;;  %v2840_v62 = vpop.f32.mrb[122].mxu1 }
 0x4bc   :  { %v2841_v3 = vpop.f32.mrb[123].mxu1 }
 0x4bd   :  { %v2514_v4 = vadd.f32 %v2839_v61, %v3799_v18  ;;  %v2842_v9 = vadd.f32 %v2841_v3, %v2840_v62 }
 0x4be   :  { %v3057_v6 = vpop.eup %3056 }
 0x4bf   :  { %2572 = vxpose.xlu0.b32.cont [13/16] (narrow) %v2514_v4, 8  ;;  %v2517_v10 = vadd.f32 %v2842_v9, %v3799_v18  ;;  %v2596_v17 = vadd.f32 1.0, %v3057_v6 }
 0x4c1   :  { %v2598_v54 = vmul.f32 0.5, %v2596_v17 }
 0x4c3   :  { %2573 = vxpose.xlu0.b32.cont [14/16] (narrow) %v2517_v10, 8  ;;  %v2843_v11 = vpop.f32.mrb[124].mxu1 }
 0x4c4   :  { %v2844_v12 = vpop.f32.mrb[125].mxu1 }
 0x4c5   :  { %v2845_v13 = vadd.f32 %v2844_v12, %v2843_v11  ;;  %v2846_v14 = vpop.f32.mrb[126].mxu1 }
 0x4c6   :  { %v2847_v15 = vpop.f32.mrb[127].mxu1 }
 0x4c7   :  { %v2522_v16 = vadd.f32 %v2845_v13, %v3799_v18  ;;  %v2848_v7 = vadd.f32 %v2847_v15, %v2846_v14 }
 0x4c9   :  { %2574 = vxpose.xlu0.b32.cont [15/16] (narrow) %v2522_v16, 8  ;;  %v2525_v8 = vadd.f32 %v2848_v7, %v3799_v18 }
 0x4cd   :  { %2575 = vxpose.xlu0.b32.end [16/16] (narrow) %v2525_v8, 8 }
 0x511   :  { %v2576_v5 = vpop.trf.xlu0 }
 0x512   :  { %v2593_v35 = vmul.f32 0.5, %v2576_v5 }
 0x514   :  { %3058 = vtanh.f32 %v2593_v35 }
 0x51e   :  { %v3059_v22 = vpop.eup %3058 }
 0x51f   :  { %v2597_v57 = vadd.f32 1.0, %v3059_v22 }
 0x521   :  { %v2599_v23 = vmul.f32 0.5, %v2597_v57 }
 0x523   :  { %v2602_v24 = vcombine.low %v2598_v54, %v2599_v23 }
 0x525   :  { %2604 = vst [vmem:[#allocation5] sm:$0xff] %v2602_v24 }
 0x526   :  { %3093 = shalt.err (!%p3090_p12)
}
 0x527   :  { %s3094_s18 = scalar_lea.hbm %s3851_s6, 128 }
 0x528   :  { %p3095_p13 = scmp.ne.s32.totalorder %s3851_s6, %s3094_s18  ;;  %p3098_p0 = scmp.lt.u32.totalorder %s3094_s18, %s3851_s6 }
 0x52a   :  { %p3100_p1 = pnand %p3098_p0, %p3095_p13 }
 0x52c   :  { %3103 = shalt.err (!%p3100_p1)
}
 0x52d   :  { %2614 = dma.vmem_to_hbm [thread:$0]  %s2612_s3, 128, %s3851_s6, [#allocation4]  }
 0x52e   :  { %3106 = dma.done.wait [#allocation4], 128  }
 0x52f   :  { %3107 = vsyncadd [#allocation4], 4294967168 }
 0x530   :  { %2618 = vsyncpa [#allocation3], 1 }
 0x531   :  { %2619 = vsyncpa [#allocation4], 1 }

</bundles_post_ra>
